<compile_context>
chip_gen: v7x
topology: tpu7x:2x2x1
jax: 0.10.0
libtpu: 0.0.40
codegen_flags: <defaults>
</compile_context>

<pallas_src>
import functools
import math

import jax
import jax.numpy as jnp
from jax.experimental import pallas as pl
from jax.experimental.pallas import tpu as pltpu


def _layernorm(x, gamma, beta, eps=1e-5):
    mu = jnp.mean(x, axis=-1, keepdims=True)
    xc = x - mu
    var = jnp.mean(xc * xc, axis=-1, keepdims=True)
    return xc * jax.lax.rsqrt(var + eps) * gamma + beta


def encoder_kernel(x_ref,
                   w4_ref, b4_ref,          # fused [input-proj | Q | K | V]
                   wo_ref,
                   w1_ref, b1_ref, w2_ref,
                   vecs_ref,                # rows: bo, g1, be1, b2, g2, be2
                   o_ref,
                   *, num_heads):
    bf16 = jnp.bfloat16
    Bt, S, Din = x_ref.shape
    H = wo_ref.shape[0]
    nh = num_heads
    hd = H // nh
    M = Bt * S

    # Flatten batch into the matmul M dimension (leading-dim merge: layout-safe).
    x = x_ref[...].reshape(M, Din)

    vecs = vecs_ref[...]                       # (6, H) f32, loaded once
    bo, g1, be1 = vecs[0:1], vecs[1:2], vecs[2:3]
    b2, g2, be2 = vecs[3:4], vecs[4:5], vecs[5:6]

    # ---- single fused projection: [h | q*scale | k | v] ----  (bf16 MXU, f32 acc)
    # (the 1/sqrt(hd) attention scale is pre-folded into the Q columns of w4/b4)
    hqkv = jnp.dot(x.astype(bf16), w4_ref[...],
                   preferred_element_type=jnp.float32) + b4_ref[...]    # (M, 4H) f32
    h = hqkv[:, 0:H]                                                    # (M, H)
    q = hqkv[:, H:2 * H].reshape(Bt, S, H)
    k = hqkv[:, 2 * H:3 * H].reshape(Bt, S, H)
    v = hqkv[:, 3 * H:4 * H].reshape(Bt, S, H)

    # Head split via static lane slices stacked along a new leading (head) axis:
    # result index along axis 0 is head * Bt + b.  (No minor-dim reshapes.)
    def split_heads(t):
        return jnp.concatenate(
            [t[:, :, i * hd:(i + 1) * hd] for i in range(nh)], axis=0)  # (nh*Bt, S, hd)

    qh = split_heads(q).astype(bf16)
    kh = split_heads(k).astype(bf16)
    vh = split_heads(v).astype(bf16)

    # ---- head-batched attention, single softmax over all (b, head) pairs ----
    s = jnp.einsum('bqd,bkd->bqk', qh, kh,
                   preferred_element_type=jnp.float32)                  # (nh*Bt, S, S) f32
    s = s - jnp.max(s, axis=-1, keepdims=True)
    p = jnp.exp(s)
    p = p / jnp.sum(p, axis=-1, keepdims=True)   # exact reciprocal (approx removed)

    ao = jnp.einsum('bqk,bkd->bqd', p.astype(bf16), vh,
                    preferred_element_type=jnp.float32)                 # (nh*Bt, S, hd)

    # Merge heads back: head-major along the hidden axis (matches torch MHA layout).
    attn = jnp.concatenate(
        [ao[i * Bt:(i + 1) * Bt] for i in range(nh)], axis=-1).reshape(M, H)
    attn = jnp.dot(attn.astype(bf16), wo_ref[...],
                   preferred_element_type=jnp.float32) + bo

    # ---- residual + LayerNorm 1 (f32) ----
    y = _layernorm(h + attn, g1, be1)

    # ---- feed-forward (ReLU) + residual + LayerNorm 2 ----
    ff = jnp.maximum(
        jnp.dot(y.astype(bf16), w1_ref[...],
                preferred_element_type=jnp.float32) + b1_ref[...], 0.0)
    ff = jnp.dot(ff.astype(bf16), w2_ref[...],
                 preferred_element_type=jnp.float32) + b2
    z = _layernorm(y + ff, g2, be2)

    o_ref[...] = z.reshape(Bt, S, H)


def prepare_params(params, num_heads):
    """One-time weight prep, hoisted out of the forward (would be cached /
    jitted constants in a real model): fold the attention scale into Q, compose
    the input projection with the fused QKV projection (all in f32), pack the
    small (1, H) vectors into one array, and cast MXU operands to bf16 once."""
    f32, bf16 = jnp.float32, jnp.bfloat16
    H = params['w_lin'].shape[1]
    hd = H // num_heads
    scale = 1.0 / math.sqrt(hd)

    # Fold 1/sqrt(hd) into the (static) Q projection weights/bias.
    wqkv = jnp.concatenate(
        [params['wq'] * scale, params['wk'], params['wv']], axis=1).astype(f32)  # (H, 3H)
    bqkv = jnp.concatenate(
        [params['bq'] * scale, params['bk'], params['bv']], axis=1).astype(f32)  # (1, 3H)

    # Compose input projection with QKV projection (f32 composition, single cast):
    #   h   = x @ w_lin + b_lin
    #   qkv = h @ wqkv + bqkv = x @ (w_lin @ wqkv) + (b_lin @ wqkv + bqkv)
    w4 = jnp.concatenate([params['w_lin'], params['w_lin'] @ wqkv], axis=1)       # (Din, 4H)
    b4 = jnp.concatenate([params['b_lin'], params['b_lin'] @ wqkv + bqkv], axis=1)  # (1, 4H)

    vecs = jnp.concatenate(
        [params['bo'], params['g1'], params['be1'],
         params['b2'], params['g2'], params['be2']], axis=0).astype(f32)          # (6, H)

    return {
        'w4': w4.astype(bf16), 'b4': b4.astype(f32),
        'wo': params['wo'].astype(bf16),
        'w1': params['w1'].astype(bf16), 'b1': params['b1'].astype(f32),
        'w2': params['w2'].astype(bf16),
        'vecs': vecs,
    }


def _pick_block_b(B, S):
    """Aim for M = block_b*S >= 256 (v6e/v7x MXU tile) while keeping >= 2 grid
    steps on the 'parallel' axis when possible (shards across v7x's 2 TCs)."""
    divisors = [d for d in range(1, B + 1) if B % d == 0]
    cand = [d for d in divisors if d < B and d * S >= 256]
    if cand:
        return max(cand)                    # big tiles AND >= 2 grid steps
    cand = [d for d in divisors if d * S >= 256]
    if cand:
        return min(cand)                    # smallest tile that still fills the MXU
    # Batch too small to fill the MXU anyway (overhead-bound): keep >= 2 grid
    # steps if possible so v7x still uses both TensorCores.
    return max(d for d in divisors if d <= max(1, B // 2))


def encoder_llata(x, prepped, *, num_heads, block_b=None):
    B, S, Din = x.shape
    H = prepped['wo'].shape[0]
    FF = prepped['w1'].shape[1]
    if block_b is None:
        block_b = _pick_block_b(B, S)
    assert B % block_b == 0
    grid_steps = B // block_b

    weights = [prepped['w4'], prepped['b4'], prepped['wo'],
               prepped['w1'], prepped['b1'], prepped['w2'], prepped['vecs']]

    def full_spec(a):
        return pl.BlockSpec(a.shape, lambda b, n=a.ndim: (0,) * n)

    in_specs = ([pl.BlockSpec((block_b, S, Din), lambda b: (b, 0, 0))]
                + [full_spec(w) for w in weights])
    out_spec = pl.BlockSpec((block_b, S, H), lambda b: (b, 0, 0))

    # Advisory cost hint for XLA's scheduler around the custom call.
    hd = H // num_heads
    flops = 2 * B * S * (Din * 4 * H + H * H + 2 * H * FF) \
            + 4 * B * num_heads * S * S * hd
    transcendentals = B * num_heads * S * S
    weight_bytes = sum(int(w.size) * w.dtype.itemsize for w in weights)
    bytes_accessed = int(x.size) * 4 + B * S * H * 4 + weight_bytes * grid_steps
    cost = pl.CostEstimate(flops=int(flops),
                           transcendentals=int(transcendentals),
                           bytes_accessed=int(bytes_accessed))

    kernel = functools.partial(encoder_kernel, num_heads=num_heads)
    return pl.pallas_call(
        kernel,
        out_shape=jax.ShapeDtypeStruct((B, S, H), jnp.float32),
        grid_spec=pltpu.PrefetchScalarGridSpec(
            num_scalar_prefetch=0,
            grid=(grid_steps,),
            in_specs=in_specs,
            out_specs=out_spec,
        ),
        compiler_params=pltpu.CompilerParams(
            dimension_semantics=("parallel",)),
        cost_estimate=cost,
    )(x, *weights)


def ref_forward(x, p, num_heads):
    """Pure-JAX f32 reference matching PyTorch post-norm TransformerEncoderLayer (eval)."""
    h = x @ p['w_lin'] + p['b_lin'][0]
    B, S, H = h.shape
    hd = H // num_heads
    q = h @ p['wq'] + p['bq'][0]
    k = h @ p['wk'] + p['bk'][0]
    v = h @ p['wv'] + p['bv'][0]
    qh = q.reshape(B, S, num_heads, hd).transpose(0, 2, 1, 3)
    kh = k.reshape(B, S, num_heads, hd).transpose(0, 2, 1, 3)
    vh = v.reshape(B, S, num_heads, hd).transpose(0, 2, 1, 3)
    s = jnp.einsum('bhqd,bhkd->bhqk', qh, kh) / jnp.sqrt(jnp.float32(hd))
    pr = jax.nn.softmax(s, axis=-1)
    o = jnp.einsum('bhqk,bhkd->bhqd', pr, vh).transpose(0, 2, 1, 3).reshape(B, S, H)
    o = o @ p['wo'] + p['bo'][0]

    def ln(t, g, b):
        mu = t.mean(-1, keepdims=True)
        var = ((t - mu) ** 2).mean(-1, keepdims=True)
        return (t - mu) / jnp.sqrt(var + 1e-5) * g[0] + b[0]

    y = ln(h + o, p['g1'], p['be1'])
    ff = jax.nn.relu(y @ p['w1'] + p['b1'][0]) @ p['w2'] + p['b2'][0]
    return ln(y + ff, p['g2'], p['be2'])


def make_params(key, input_dim, hidden_dim, dim_feedforward):
    ks = jax.random.split(key, 16)
    std = 0.02
    f32 = jnp.float32

    def rnd(k, shape, s=std):
        return jax.random.normal(k, shape, f32) * s

    params = {
        'w_lin': rnd(ks[0], (input_dim, hidden_dim)),
        'b_lin': rnd(ks[7], (1, hidden_dim)),
        'wq': rnd(ks[1], (hidden_dim, hidden_dim)),
        'bq': rnd(ks[8], (1, hidden_dim)),
        'wk': rnd(ks[2], (hidden_dim, hidden_dim)),
        'bk': rnd(ks[9], (1, hidden_dim)),
        'wv': rnd(ks[3], (hidden_dim, hidden_dim)),
        'bv': rnd(ks[10], (1, hidden_dim)),
        'wo': rnd(ks[4], (hidden_dim, hidden_dim)),
        'bo': rnd(ks[11], (1, hidden_dim)),
        'g1': jnp.ones((1, hidden_dim), f32) + rnd(ks[12], (1, hidden_dim), 0.05),
        'be1': rnd(ks[13], (1, hidden_dim), 0.05),
        'w1': rnd(ks[5], (hidden_dim, dim_feedforward)),
        'b1': rnd(ks[14], (1, dim_feedforward)),
        'w2': rnd(ks[6], (dim_feedforward, hidden_dim)),
        'b2': rnd(ks[15], (1, hidden_dim)),
        'g2': jnp.ones((1, hidden_dim), f32),
        'be2': jnp.zeros((1, hidden_dim), f32),
    }
    return params


if __name__ == "__main__":
    # Small shapes consistent with the module:
    #   x: (batch=2, seq=8, input_dim=16), hidden_dim=32, num_heads=4,
    #   dim_feedforward=2048 (torch TransformerEncoderLayer default).
    B, S, INPUT_DIM = 2, 8, 16
    HIDDEN_DIM, NUM_HEADS, DIM_FF = 32, 4, 2048

    key = jax.random.PRNGKey(0)
    kx, kp = jax.random.split(key)
    x = jax.random.normal(kx, (B, S, INPUT_DIM), jnp.float32)
    params = make_params(kp, INPUT_DIM, HIDDEN_DIM, DIM_FF)

    # One-time weight prep, hoisted out of the forward path.
    prepped = prepare_params(params, NUM_HEADS)
    prepped = jax.tree_util.tree_map(lambda a: jax.block_until_ready(a), prepped)

    out = encoder_llata(x, prepped, num_heads=NUM_HEADS)
    out = jax.block_until_ready(out)

    ref = jax.block_until_ready(ref_forward(x, params, NUM_HEADS))
    assert out.shape == (B, S, HIDDEN_DIM)
    # Tolerance accounts for bf16 MXU operands (f32 accumulate) and the f32
    # composition w_lin @ wqkv being cast to bf16 once; softmax reciprocal is exact.
    err = float(jnp.max(jnp.abs(out - ref)))
    assert err < 5e-2, f"Pallas kernel mismatch vs JAX reference: max|err|={err}"

    # TODO(synk): dropout layers (p=0.1) are treated as identity (eval-mode semantics).
    print("KERNEL_OK")
</pallas_src>

<mosaic_0001>
module attributes {stable_mosaic.version = 11 : i64} {
  func.func @encoder_kernel(%arg0: i32, %arg1: memref<1x8x16xf32, #tpu.memory_space<vmem>>, %arg2: memref<16x128xbf16, #tpu.memory_space<vmem>>, %arg3: memref<1x128xf32, #tpu.memory_space<vmem>>, %arg4: memref<32x32xbf16, #tpu.memory_space<vmem>>, %arg5: memref<32x2048xbf16, #tpu.memory_space<vmem>>, %arg6: memref<1x2048xf32, #tpu.memory_space<vmem>>, %arg7: memref<2048x32xbf16, #tpu.memory_space<vmem>>, %arg8: memref<6x32xf32, #tpu.memory_space<vmem>>, %arg9: memref<1x8x32xf32, #tpu.memory_space<vmem>>) attributes {dimension_semantics = [#tpu.dimension_semantics<parallel>], iteration_bounds = array<i64: 2>, scalar_prefetch = 0 : i64, scratch_operands = 0 : i64, tpu.core_type = #tpu.core_type<tc>, window_params = [{transform_indices = @transform_0, window_bounds = array<i64: 1, 8, 16>}, {pipeline_mode = #tpu.pipeline_mode<synchronous>, transform_indices = @transform_1, window_bounds = array<i64: 16, 128>}, {pipeline_mode = #tpu.pipeline_mode<synchronous>, transform_indices = @transform_2, window_bounds = array<i64: 1, 128>}, {pipeline_mode = #tpu.pipeline_mode<synchronous>, transform_indices = @transform_3, window_bounds = array<i64: 32, 32>}, {pipeline_mode = #tpu.pipeline_mode<synchronous>, transform_indices = @transform_4, window_bounds = array<i64: 32, 2048>}, {pipeline_mode = #tpu.pipeline_mode<synchronous>, transform_indices = @transform_5, window_bounds = array<i64: 1, 2048>}, {pipeline_mode = #tpu.pipeline_mode<synchronous>, transform_indices = @transform_6, window_bounds = array<i64: 2048, 32>}, {pipeline_mode = #tpu.pipeline_mode<synchronous>, transform_indices = @transform_7, window_bounds = array<i64: 6, 32>}, {transform_indices = @transform_8, window_bounds = array<i64: 1, 8, 32>}]} {
    %c0 = arith.constant 0 : index
    %c0_0 = arith.constant 0 : index
    %c0_1 = arith.constant 0 : index
    %0 = vector.load %arg1[%c0, %c0_0, %c0_1] : memref<1x8x16xf32, #tpu.memory_space<vmem>>, vector<1x8x16xf32>
    %1 = vector.shape_cast %0 : vector<1x8x16xf32> to vector<8x16xf32>
    %c0_2 = arith.constant 0 : index
    %c0_3 = arith.constant 0 : index
    %2 = vector.load %arg8[%c0_2, %c0_3] : memref<6x32xf32, #tpu.memory_space<vmem>>, vector<6x32xf32>
    %3 = vector.extract_strided_slice %2 {offsets = [0, 0], sizes = [1, 32], strides = [1, 1]} : vector<6x32xf32> to vector<1x32xf32>
    %4 = vector.extract_strided_slice %2 {offsets = [1, 0], sizes = [1, 32], strides = [1, 1]} : vector<6x32xf32> to vector<1x32xf32>
    %5 = vector.extract_strided_slice %2 {offsets = [2, 0], sizes = [1, 32], strides = [1, 1]} : vector<6x32xf32> to vector<1x32xf32>
    %6 = vector.extract_strided_slice %2 {offsets = [3, 0], sizes = [1, 32], strides = [1, 1]} : vector<6x32xf32> to vector<1x32xf32>
    %7 = vector.extract_strided_slice %2 {offsets = [4, 0], sizes = [1, 32], strides = [1, 1]} : vector<6x32xf32> to vector<1x32xf32>
    %8 = vector.extract_strided_slice %2 {offsets = [5, 0], sizes = [1, 32], strides = [1, 1]} : vector<6x32xf32> to vector<1x32xf32>
    %9 = arith.truncf %1 : vector<8x16xf32> to vector<8x16xbf16>
    %c0_4 = arith.constant 0 : index
    %c0_5 = arith.constant 0 : index
    %10 = vector.load %arg2[%c0_4, %c0_5] : memref<16x128xbf16, #tpu.memory_space<vmem>>, vector<16x128xbf16>
    %cst = arith.constant dense<0.000000e+00> : vector<8x128xf32>
    %11 = tpu.matmul %9, %10, %cst {dimension_numbers = #tpu.dot_dimension_numbers<[1], [0], [0], [1], [0, 0, 1, 1], [], []>} : vector<8x16xbf16>, vector<16x128xbf16>, vector<8x128xf32> -> vector<8x128xf32>
    %c0_6 = arith.constant 0 : index
    %c0_7 = arith.constant 0 : index
    %12 = vector.load %arg3[%c0_6, %c0_7] : memref<1x128xf32, #tpu.memory_space<vmem>>, vector<1x128xf32>
    %13 = vector.broadcast %12 : vector<1x128xf32> to vector<8x128xf32>
    %14 = arith.addf %11, %13 : vector<8x128xf32>
    %15 = vector.extract_strided_slice %14 {offsets = [0, 0], sizes = [8, 32], strides = [1, 1]} : vector<8x128xf32> to vector<8x32xf32>
    %16 = vector.extract_strided_slice %14 {offsets = [0, 32], sizes = [8, 32], strides = [1, 1]} : vector<8x128xf32> to vector<8x32xf32>
    %17 = vector.shape_cast %16 : vector<8x32xf32> to vector<1x8x32xf32>
    %18 = vector.extract_strided_slice %14 {offsets = [0, 64], sizes = [8, 32], strides = [1, 1]} : vector<8x128xf32> to vector<8x32xf32>
    %19 = vector.shape_cast %18 : vector<8x32xf32> to vector<1x8x32xf32>
    %20 = vector.extract_strided_slice %14 {offsets = [0, 96], sizes = [8, 32], strides = [1, 1]} : vector<8x128xf32> to vector<8x32xf32>
    %21 = vector.shape_cast %20 : vector<8x32xf32> to vector<1x8x32xf32>
    %22 = vector.extract_strided_slice %17 {offsets = [0, 0, 0], sizes = [1, 8, 8], strides = [1, 1, 1]} : vector<1x8x32xf32> to vector<1x8x8xf32>
    %23 = vector.extract_strided_slice %17 {offsets = [0, 0, 8], sizes = [1, 8, 8], strides = [1, 1, 1]} : vector<1x8x32xf32> to vector<1x8x8xf32>
    %24 = vector.extract_strided_slice %17 {offsets = [0, 0, 16], sizes = [1, 8, 8], strides = [1, 1, 1]} : vector<1x8x32xf32> to vector<1x8x8xf32>
    %25 = vector.extract_strided_slice %17 {offsets = [0, 0, 24], sizes = [1, 8, 8], strides = [1, 1, 1]} : vector<1x8x32xf32> to vector<1x8x8xf32>
    %26 = tpu.concatenate %22, %23, %24, %25 in 0 : vector<1x8x8xf32>, vector<1x8x8xf32>, vector<1x8x8xf32>, vector<1x8x8xf32> -> vector<4x8x8xf32>
    %27 = arith.truncf %26 : vector<4x8x8xf32> to vector<4x8x8xbf16>
    %28 = vector.extract_strided_slice %19 {offsets = [0, 0, 0], sizes = [1, 8, 8], strides = [1, 1, 1]} : vector<1x8x32xf32> to vector<1x8x8xf32>
    %29 = vector.extract_strided_slice %19 {offsets = [0, 0, 8], sizes = [1, 8, 8], strides = [1, 1, 1]} : vector<1x8x32xf32> to vector<1x8x8xf32>
    %30 = vector.extract_strided_slice %19 {offsets = [0, 0, 16], sizes = [1, 8, 8], strides = [1, 1, 1]} : vector<1x8x32xf32> to vector<1x8x8xf32>
    %31 = vector.extract_strided_slice %19 {offsets = [0, 0, 24], sizes = [1, 8, 8], strides = [1, 1, 1]} : vector<1x8x32xf32> to vector<1x8x8xf32>
    %32 = tpu.concatenate %28, %29, %30, %31 in 0 : vector<1x8x8xf32>, vector<1x8x8xf32>, vector<1x8x8xf32>, vector<1x8x8xf32> -> vector<4x8x8xf32>
    %33 = arith.truncf %32 : vector<4x8x8xf32> to vector<4x8x8xbf16>
    %34 = vector.extract_strided_slice %21 {offsets = [0, 0, 0], sizes = [1, 8, 8], strides = [1, 1, 1]} : vector<1x8x32xf32> to vector<1x8x8xf32>
    %35 = vector.extract_strided_slice %21 {offsets = [0, 0, 8], sizes = [1, 8, 8], strides = [1, 1, 1]} : vector<1x8x32xf32> to vector<1x8x8xf32>
    %36 = vector.extract_strided_slice %21 {offsets = [0, 0, 16], sizes = [1, 8, 8], strides = [1, 1, 1]} : vector<1x8x32xf32> to vector<1x8x8xf32>
    %37 = vector.extract_strided_slice %21 {offsets = [0, 0, 24], sizes = [1, 8, 8], strides = [1, 1, 1]} : vector<1x8x32xf32> to vector<1x8x8xf32>
    %38 = tpu.concatenate %34, %35, %36, %37 in 0 : vector<1x8x8xf32>, vector<1x8x8xf32>, vector<1x8x8xf32>, vector<1x8x8xf32> -> vector<4x8x8xf32>
    %39 = arith.truncf %38 : vector<4x8x8xf32> to vector<4x8x8xbf16>
    "tpu.trace_start"() <{level = 10 : i32, message = "bqd,bkd->bqk"}> : () -> ()
    %cst_8 = arith.constant dense<0.000000e+00> : vector<4x8x8xf32>
    %40 = tpu.matmul %27, %33, %cst_8 {dimension_numbers = #tpu.dot_dimension_numbers<[2], [2], [1], [1], [0, 0, 0, 1, 1, 1], [0], [0]>} : vector<4x8x8xbf16>, vector<4x8x8xbf16>, vector<4x8x8xf32> -> vector<4x8x8xf32>
    "tpu.trace_stop"() : () -> ()
    %cst_9 = arith.constant dense<0xFF800000> : vector<4x8xf32>
    %41 = vector.multi_reduction <maximumf>, %40, %cst_9 [2] : vector<4x8x8xf32> to vector<4x8xf32>
    %42 = vector.shape_cast %41 : vector<4x8xf32> to vector<4x8x1xf32>
    %43 = vector.broadcast %42 : vector<4x8x1xf32> to vector<4x8x8xf32>
    %44 = arith.subf %40, %43 : vector<4x8x8xf32>
    %45 = math.exp %44 : vector<4x8x8xf32>
    %cst_10 = arith.constant dense<0.000000e+00> : vector<4x8xf32>
    %46 = vector.multi_reduction <add>, %45, %cst_10 [2] : vector<4x8x8xf32> to vector<4x8xf32>
    %47 = vector.shape_cast %46 : vector<4x8xf32> to vector<4x8x1xf32>
    %48 = vector.broadcast %47 : vector<4x8x1xf32> to vector<4x8x8xf32>
    %49 = arith.divf %45, %48 : vector<4x8x8xf32>
    %50 = arith.truncf %49 : vector<4x8x8xf32> to vector<4x8x8xbf16>
    "tpu.trace_start"() <{level = 10 : i32, message = "bqk,bkd->bqd"}> : () -> ()
    %cst_11 = arith.constant dense<0.000000e+00> : vector<4x8x8xf32>
    %51 = tpu.matmul %50, %39, %cst_11 {dimension_numbers = #tpu.dot_dimension_numbers<[2], [1], [1], [2], [0, 0, 0, 1, 1, 2], [0], [0]>} : vector<4x8x8xbf16>, vector<4x8x8xbf16>, vector<4x8x8xf32> -> vector<4x8x8xf32>
    "tpu.trace_stop"() : () -> ()
    %52 = vector.extract_strided_slice %51 {offsets = [0, 0, 0], sizes = [1, 8, 8], strides = [1, 1, 1]} : vector<4x8x8xf32> to vector<1x8x8xf32>
    %53 = vector.extract_strided_slice %51 {offsets = [1, 0, 0], sizes = [1, 8, 8], strides = [1, 1, 1]} : vector<4x8x8xf32> to vector<1x8x8xf32>
    %54 = vector.extract_strided_slice %51 {offsets = [2, 0, 0], sizes = [1, 8, 8], strides = [1, 1, 1]} : vector<4x8x8xf32> to vector<1x8x8xf32>
    %55 = vector.extract_strided_slice %51 {offsets = [3, 0, 0], sizes = [1, 8, 8], strides = [1, 1, 1]} : vector<4x8x8xf32> to vector<1x8x8xf32>
    %56 = tpu.concatenate %52, %53, %54, %55 in 2 : vector<1x8x8xf32>, vector<1x8x8xf32>, vector<1x8x8xf32>, vector<1x8x8xf32> -> vector<1x8x32xf32>
    %57 = vector.shape_cast %56 : vector<1x8x32xf32> to vector<8x32xf32>
    %58 = arith.truncf %57 : vector<8x32xf32> to vector<8x32xbf16>
    %c0_12 = arith.constant 0 : index
    %c0_13 = arith.constant 0 : index
    %59 = vector.load %arg4[%c0_12, %c0_13] : memref<32x32xbf16, #tpu.memory_space<vmem>>, vector<32x32xbf16>
    %cst_14 = arith.constant dense<0.000000e+00> : vector<8x32xf32>
    %60 = tpu.matmul %58, %59, %cst_14 {dimension_numbers = #tpu.dot_dimension_numbers<[1], [0], [0], [1], [0, 0, 1, 1], [], []>} : vector<8x32xbf16>, vector<32x32xbf16>, vector<8x32xf32> -> vector<8x32xf32>
    %61 = vector.broadcast %3 : vector<1x32xf32> to vector<8x32xf32>
    %62 = arith.addf %60, %61 : vector<8x32xf32>
    %63 = arith.addf %15, %62 : vector<8x32xf32>
    %cst_15 = arith.constant dense<0.000000e+00> : vector<8xf32>
    %64 = vector.multi_reduction <add>, %63, %cst_15 [1] : vector<8x32xf32> to vector<8xf32>
    %65 = vector.shape_cast %64 : vector<8xf32> to vector<8x1xf32>
    %cst_16 = arith.constant 3.200000e+01 : f32
    %66 = vector.broadcast %cst_16 : f32 to vector<8x1xf32>
    %67 = arith.divf %65, %66 : vector<8x1xf32>
    %68 = vector.broadcast %67 : vector<8x1xf32> to vector<8x32xf32>
    %69 = arith.subf %63, %68 : vector<8x32xf32>
    %70 = arith.mulf %69, %69 : vector<8x32xf32>
    %cst_17 = arith.constant dense<0.000000e+00> : vector<8xf32>
    %71 = vector.multi_reduction <add>, %70, %cst_17 [1] : vector<8x32xf32> to vector<8xf32>
    %72 = vector.shape_cast %71 : vector<8xf32> to vector<8x1xf32>
    %cst_18 = arith.constant 3.200000e+01 : f32
    %73 = vector.broadcast %cst_18 : f32 to vector<8x1xf32>
    %74 = arith.divf %72, %73 : vector<8x1xf32>
    %cst_19 = arith.constant 9.99999974E-6 : f32
    %75 = vector.broadcast %cst_19 : f32 to vector<8x1xf32>
    %76 = arith.addf %74, %75 : vector<8x1xf32>
    %77 = math.rsqrt %76 : vector<8x1xf32>
    %78 = vector.broadcast %77 : vector<8x1xf32> to vector<8x32xf32>
    %79 = arith.mulf %69, %78 : vector<8x32xf32>
    %80 = vector.broadcast %4 : vector<1x32xf32> to vector<8x32xf32>
    %81 = arith.mulf %79, %80 : vector<8x32xf32>
    %82 = vector.broadcast %5 : vector<1x32xf32> to vector<8x32xf32>
    %83 = arith.addf %81, %82 : vector<8x32xf32>
    %84 = arith.truncf %83 : vector<8x32xf32> to vector<8x32xbf16>
    %c0_20 = arith.constant 0 : index
    %c0_21 = arith.constant 0 : index
    %85 = vector.load %arg5[%c0_20, %c0_21] : memref<32x2048xbf16, #tpu.memory_space<vmem>>, vector<32x2048xbf16>
    %cst_22 = arith.constant dense<0.000000e+00> : vector<8x2048xf32>
    %86 = tpu.matmul %84, %85, %cst_22 {dimension_numbers = #tpu.dot_dimension_numbers<[1], [0], [0], [1], [0, 0, 1, 1], [], []>} : vector<8x32xbf16>, vector<32x2048xbf16>, vector<8x2048xf32> -> vector<8x2048xf32>
    %c0_23 = arith.constant 0 : index
    %c0_24 = arith.constant 0 : index
    %87 = vector.load %arg6[%c0_23, %c0_24] : memref<1x2048xf32, #tpu.memory_space<vmem>>, vector<1x2048xf32>
    %88 = vector.broadcast %87 : vector<1x2048xf32> to vector<8x2048xf32>
    %89 = arith.addf %86, %88 : vector<8x2048xf32>
    %cst_25 = arith.constant 0.000000e+00 : f32
    %90 = vector.broadcast %cst_25 : f32 to vector<8x2048xf32>
    %91 = arith.maximumf %89, %90 : vector<8x2048xf32>
    %92 = arith.truncf %91 : vector<8x2048xf32> to vector<8x2048xbf16>
    %c0_26 = arith.constant 0 : index
    %c0_27 = arith.constant 0 : index
    %93 = vector.load %arg7[%c0_26, %c0_27] : memref<2048x32xbf16, #tpu.memory_space<vmem>>, vector<2048x32xbf16>
    %cst_28 = arith.constant dense<0.000000e+00> : vector<8x32xf32>
    %94 = tpu.matmul %92, %93, %cst_28 {dimension_numbers = #tpu.dot_dimension_numbers<[1], [0], [0], [1], [0, 0, 1, 1], [], []>} : vector<8x2048xbf16>, vector<2048x32xbf16>, vector<8x32xf32> -> vector<8x32xf32>
    %95 = vector.broadcast %6 : vector<1x32xf32> to vector<8x32xf32>
    %96 = arith.addf %94, %95 : vector<8x32xf32>
    %97 = arith.addf %83, %96 : vector<8x32xf32>
    %cst_29 = arith.constant dense<0.000000e+00> : vector<8xf32>
    %98 = vector.multi_reduction <add>, %97, %cst_29 [1] : vector<8x32xf32> to vector<8xf32>
    %99 = vector.shape_cast %98 : vector<8xf32> to vector<8x1xf32>
    %cst_30 = arith.constant 3.200000e+01 : f32
    %100 = vector.broadcast %cst_30 : f32 to vector<8x1xf32>
    %101 = arith.divf %99, %100 : vector<8x1xf32>
    %102 = vector.broadcast %101 : vector<8x1xf32> to vector<8x32xf32>
    %103 = arith.subf %97, %102 : vector<8x32xf32>
    %104 = arith.mulf %103, %103 : vector<8x32xf32>
    %cst_31 = arith.constant dense<0.000000e+00> : vector<8xf32>
    %105 = vector.multi_reduction <add>, %104, %cst_31 [1] : vector<8x32xf32> to vector<8xf32>
    %106 = vector.shape_cast %105 : vector<8xf32> to vector<8x1xf32>
    %cst_32 = arith.constant 3.200000e+01 : f32
    %107 = vector.broadcast %cst_32 : f32 to vector<8x1xf32>
    %108 = arith.divf %106, %107 : vector<8x1xf32>
    %cst_33 = arith.constant 9.99999974E-6 : f32
    %109 = vector.broadcast %cst_33 : f32 to vector<8x1xf32>
    %110 = arith.addf %108, %109 : vector<8x1xf32>
    %111 = math.rsqrt %110 : vector<8x1xf32>
    %112 = vector.broadcast %111 : vector<8x1xf32> to vector<8x32xf32>
    %113 = arith.mulf %103, %112 : vector<8x32xf32>
    %114 = vector.broadcast %7 : vector<1x32xf32> to vector<8x32xf32>
    %115 = arith.mulf %113, %114 : vector<8x32xf32>
    %116 = vector.broadcast %8 : vector<1x32xf32> to vector<8x32xf32>
    %117 = arith.addf %115, %116 : vector<8x32xf32>
    %118 = vector.shape_cast %117 : vector<8x32xf32> to vector<1x8x32xf32>
    %c0_34 = arith.constant 0 : index
    %c0_35 = arith.constant 0 : index
    %c0_36 = arith.constant 0 : index
    %119 = vector.load %arg9[%c0_34, %c0_35, %c0_36] : memref<1x8x32xf32, #tpu.memory_space<vmem>>, vector<1x8x32xf32>
    tpu.vector_store %arg9[%c0_34, %c0_35, %c0_36], %118 {strides = array<i32>} : memref<1x8x32xf32, #tpu.memory_space<vmem>>, vector<1x8x32xf32>,
    return
  }
  func.func @transform_0(%arg0: i32) -> (i32, i32, i32) {
    %c0_i32 = arith.constant 0 : i32
    %c0_i32_0 = arith.constant 0 : i32
    %c0_i32_1 = arith.constant 0 : i32
    return %arg0, %c0_i32, %c0_i32_0 : i32, i32, i32
  }
  func.func @transform_1(%arg0: i32) -> (i32, i32) {
    %c0_i32 = arith.constant 0 : i32
    %c0_i32_0 = arith.constant 0 : i32
    %c0_i32_1 = arith.constant 0 : i32
    return %c0_i32, %c0_i32_0 : i32, i32
  }
  func.func @transform_2(%arg0: i32) -> (i32, i32) {
    %c0_i32 = arith.constant 0 : i32
    %c0_i32_0 = arith.constant 0 : i32
    %c0_i32_1 = arith.constant 0 : i32
    return %c0_i32, %c0_i32_0 : i32, i32
  }
  func.func @transform_3(%arg0: i32) -> (i32, i32) {
    %c0_i32 = arith.constant 0 : i32
    %c0_i32_0 = arith.constant 0 : i32
    %c0_i32_1 = arith.constant 0 : i32
    return %c0_i32, %c0_i32_0 : i32, i32
  }
  func.func @transform_4(%arg0: i32) -> (i32, i32) {
    %c0_i32 = arith.constant 0 : i32
    %c0_i32_0 = arith.constant 0 : i32
    %c0_i32_1 = arith.constant 0 : i32
    return %c0_i32, %c0_i32_0 : i32, i32
  }
  func.func @transform_5(%arg0: i32) -> (i32, i32) {
    %c0_i32 = arith.constant 0 : i32
    %c0_i32_0 = arith.constant 0 : i32
    %c0_i32_1 = arith.constant 0 : i32
    return %c0_i32, %c0_i32_0 : i32, i32
  }
  func.func @transform_6(%arg0: i32) -> (i32, i32) {
    %c0_i32 = arith.constant 0 : i32
    %c0_i32_0 = arith.constant 0 : i32
    %c0_i32_1 = arith.constant 0 : i32
    return %c0_i32, %c0_i32_0 : i32, i32
  }
  func.func @transform_7(%arg0: i32) -> (i32, i32) {
    %c0_i32 = arith.constant 0 : i32
    %c0_i32_0 = arith.constant 0 : i32
    %c0_i32_1 = arith.constant 0 : i32
    return %c0_i32, %c0_i32_0 : i32, i32
  }
  func.func @transform_8(%arg0: i32) -> (i32, i32, i32) {
    %c0_i32 = arith.constant 0 : i32
    %c0_i32_0 = arith.constant 0 : i32
    %c0_i32_1 = arith.constant 0 : i32
    return %arg0, %c0_i32, %c0_i32_0 : i32, i32, i32
  }
}

</mosaic_0001>

<bundles_post_ra>
// kernel: tpu_custom_call.1
= control target key start
LH: loop header
LB: loop body
LE: loop exit
PB: predicated region body
PF: predicated region fallthrough
CT: control target
= control target key end

     0   :  { %13 = vsyncpa [#allocation3], 0  ;;  %s4628_s0 = inlined_call_operand.vmem [shape: f32[2,8,16], index: 0, kind: input, shape index: {}]   ;;  %s4629_s1 = inlined_call_operand.vmem [shape: bf16[16,128], index: 1, kind: input, shape index: {}]   ;;  %s4630_s2 = inlined_call_operand.vmem [shape: f32[1,128], index: 2, kind: input, shape index: {}]   ;;  %s4631_s3 = inlined_call_operand.vmem [shape: bf16[32,32], index: 3, kind: input, shape index: {}]   ;;  %s4632_s4 = inlined_call_operand.vmem [shape: bf16[32,2048], index: 4, kind: input, shape index: {}]   ;;  %s4633_s5 = inlined_call_operand.vmem [shape: f32[1,2048], index: 5, kind: input, shape index: {}]   ;;  %s4634_s6 = inlined_call_operand.vmem [shape: bf16[2048,32], index: 6, kind: input, shape index: {}]   ;;  %s4635_s7 = inlined_call_operand.vmem [shape: f32[6,32], index: 7, kind: input, shape index: {}]   ;;  %s4636_s8 = inlined_call_operand.hbm [shape: f32[2,8,32], index: 8, kind: output, shape index: {}]  }
   0x1   :  { %15 = vsyncpa [#allocation3 + $0x1], 0  ;;  %s3792_s27 = smov 0   ;;  %s3794_s28 = smov 0  }
   0x2   :  { %s3796_s29 = smov 0   ;;  %s3798_s30 = smov 0  }
   0x3 LB: > { %s3813_s9 = sadd.s32 4294967295, %s3732_s30   ;;  %s3016_s10 = sadd.s32 4294967294, %s3732_s30   ;;  %s3732_s30 = sphi %s3798_s30, %s4642_s30   ;;  %s3728_s29 = sphi %s3796_s29, %s4641_s29   ;;  %s3724_s28 = sphi %s3794_s28, %s4640_s28   ;;  %s3720_s27 = sphi %s3792_s27, %s4639_s27  }
   0x4   : > { %s3817_s11 = sadd.s32 1, %s3732_s30   ;;  %s201_s12 = sadd.s32 1, %s3728_s29 }
   0x5   : > { %s198_s13 = ssub.s32 %s3732_s30, %s3817_s11  ;;  %p211_p0 = scmp.ne.s32.totalorder %s3728_s29, %s3724_s28 }
   0x6   : > { %p199_p1 = scmp.eq.s32.totalorder %s198_s13, 0  ;;  %p212_p2 = scmp.eq.s32.totalorder %s3813_s9, 1 }
   0x7   : > { %p217_p3 = scmp.ne.s32.totalorder %s3724_s28, %s3720_s27  ;;  %p218_p4 = scmp.eq.s32.totalorder %s3016_s10, 1 }
   0x8   : > { %s3828_s14 = scalar_select %p199_p1, %s3728_s29, %s201_s12  }
   0x9   : > { %p3830_p5 = por %p212_p2, %p211_p0  ;;  %p3834_p6 = por %p218_p4, %p217_p3 }
   0xa   : > { %p3019_p7 = scmp.ge.s32.totalorder %s3732_s30, 1  ;;  %p264_p8 = scmp.lt.s32.totalorder %s3732_s30, 3 }
   0xc   : > { %p265_p9 = pnand %p3019_p7, %p264_p8 }
   0xd   : > { %v3518_v0 = vld [vmem:[%s4629_s1] sm:$0xff] (!%p265_p9)   ;;  %v3734_v1 = vmov (!%p265_p9), 0.0   ;;  %p297_p10 = scmp.lt.s32.totalorder (!%p265_p9), %s3813_s9, 1  ;;  %vm3735_vm0 = vmmov (!%p265_p9), 0   ;;  %vm320_vm1 = vcmask (!%p265_p9), 130048   ;;  %s3736_s26 = smov (!%p265_p9), 104  }
   0xe   : > { %268 = sbr.rel (%p265_p9) target bundleno = 2743 (0xab7), region = 52  ;;  %3405 = vmatprep.subr.bf16.mxu0 (!%p265_p9), %v3734_v1  ;;  %3411 = vmatprep.subr.bf16.mxu1 (!%p265_p9), %v3734_v1  ;;  %v3022_v4 = vld [vmem:[%s4630_s2] ss:$0 sm:$0xff] (!%p265_p9)  ;;  %s3737_s10 = smov (!%p265_p9), 120   ;;  %vm383_vm2 = vcmask (!%p265_p9), 64512   ;;  %vm636_vm3 = vcmask (!%p265_p9), 1043456  }
   0xf   : > { %3406 = vmatpush3.bf16.msra.mxu0 (!%p265_p9), %v3518_v0  ;;  %3407 = vmatprep.mubr.msk.bf16.mxu0 (!%p265_p9), %vm3735_vm0, %v3734_v1  ;;  %s3738_s12 = smov (!%p265_p9), 112   ;;  %s3739_s13 = smov (!%p265_p9), 64   ;;  %vm838_vm4 = vcmask (!%p265_p9), 195584   ;;  %vm861_vm5 = vcmask (!%p265_p9), 261120  }
  0x10   : > { %3413 = vmatprep.mubr.msk.bf16.mxu1 (!%p265_p9), %vm3735_vm0, %v3734_v1  ;;  %3417 = vmatprep.subr.bf16.mxu0 (!%p265_p9), %v3734_v1  ;;  %s3740_s17 = smov (!%p265_p9), 96   ;;  %s3741_s18 = smov (!%p265_p9), 32  }
  0x11   : > { %s3743_s24 = smov (!%p265_p9), 16   ;;  %s3744_s25 = smov (!%p265_p9), 24  }
  0x15   : > { %s298_s19 = scalar_select %p297_p10, %s3813_s9, 1 }
  0x17   : > { %s3021_s20 = sshll.u32 %s298_s19, 3 }
  0x18   : > { %s300_s23 = scalar_lea.vmem %s4628_s0, %s3021_s20 }
  0x19   : > { %v302_v2 = vld [vmem:[%s300_s23] sm:$0xff]  ;;  %s3742_s23 = smov 8  }
  0x1a   : > { %v304_v3 = vpack.c.bf16 %v302_v2, %v302_v2 }
  0x1c   : > { %3408 = vmatmul.mubr.msk.bf16.vlgmr.msra.gmra.mrb[0].mxu0 %vm320_vm1, %v304_v3 }
  0x1d   : > { %3419 = vmatprep.mubr.msk.bf16.mxu0 %vm3735_vm0, %v3734_v1 }
  0xef   : > { %v358_v5 = vpop.f32.mrb[0].mxu0 }
  0xf0   : > { %v3861_v6 = vadd.f32 %v3022_v4, %v358_v5  ;;  %v3409_v7 = vpop.f32.mrb[1].mxu0 }
  0xf1   : > { %v361_v8 = vpop.f32.mrb[2].mxu0 }
  0xf2   : > { %371 = vrot.lane.b32.xlu1 %v3861_v6, %s3736_s26  ;;  %365 = vrot.lane.b32.xlu0 %v3861_v6, %s3737_s10  ;;  %v3410_v9 = vpop.f32.mrb[3].mxu0  ;;  %v3867_v10 = vpack.c.bf16 %v3861_v6, %v3861_v6 }
  0xf6   : > { %368 = vrot.lane.b32.xlu0 %v3861_v6, %s3738_s12  ;;  %381 = vrot.lane.b32.xlu1 %v3867_v10, %s3739_s13 }
  0xfa   : > { %379 = vrot.lane.b32.xlu1 %v3867_v10, %s3740_s17 }
 0x164   : > { %v372_v11 = vpop.permute.xlu1 %371  ;;  %v366_v12 = vpop.permute.xlu0 %365 }
 0x165   : > { %v3872_v13 = vpack.c.bf16 %v366_v12, %v366_v12  ;;  %v3882_v18 = vpack.c.bf16 %v372_v11, %v372_v11 }
 0x167   : > { %433 = vrot.lane.b32.xlu0 %v3872_v13, %s3739_s13  ;;  %431 = vrot.lane.b32.xlu1 %v3872_v13, %s3740_s17 }
 0x168   : > { %v369_v14 = vpop.permute.xlu0 %368  ;;  %v382_v15 = vpop.permute.xlu1 %381 }
 0x169   : > { %v3876_v16 = vpack.c.bf16 %v369_v14, %v369_v14  ;;  %v388_v17 = vsel %vm383_vm2, %v382_v15, 0 }
 0x16a   : > { %3412 = vmatpush3.bf16.xpose.msra.mxu1 %v388_v17 }
 0x16b   : > { %484 = vrot.lane.b32.xlu0 %v3876_v16, %s3739_s13  ;;  %482 = vrot.lane.b32.xlu1 %v3876_v16, %s3740_s17 }
 0x16c   : > { %3423 = vmatprep.subr.bf16.mxu1 %v3734_v1  ;;  %v380_v19 = vpop.permute.xlu1 %379 }
 0x16f   : > { %535 = vrot.lane.b32.xlu0 %v3882_v18, %s3739_s13  ;;  %s294_s13 = sand.u32 1, %s3724_s28  }
 0x171   : > { %3414 = vmatmul.mubr.msk.bf16.vlgmr.msra.gmra.mrb[0].mxu1 %vm383_vm2, %v380_v19 }
 0x172   : > { %3425 = vmatprep.mubr.msk.bf16.mxu1 %vm3735_vm0, %v3734_v1 }
 0x173   : > { %533 = vrot.lane.b32.xlu0 %v3882_v18, %s3740_s17  ;;  %s3020_s17 = sshll.u32 %s294_s13, 3 }
 0x174   : > { %s296_s19 = scalar_lea.vmem [#allocation2], %s3020_s17 }
 0x175   : > { %s2957_s20 = sshll.u32 %s296_s19, 4  ;;  %s4587_s20 = int_to_ptr.vmem [resolvable:$true] %s2957_s20 }
 0x1d9   : > { %v434_v20 = vpop.permute.xlu0 %433  ;;  %v432_v24 = vpop.permute.xlu1 %431 }
 0x1da   : > { %v439_v21 = vsel %vm383_vm2, %v434_v20, 0 }
 0x1db   : > { %3418 = vmatpush3.bf16.xpose.msra.mxu0 %v439_v21 }
 0x1dc   : > { %3429 = vmatprep.subr.bf16.mxu0 %v3734_v1 }
 0x1dd   : > { %v485_v22 = vpop.permute.xlu0 %484  ;;  %v483_v27 = vpop.permute.xlu1 %482 }
 0x1de   : > { %v490_v23 = vsel %vm383_vm2, %v485_v22, 0 }
 0x1df   : > { %3424 = vmatpush3.bf16.xpose.msra.mxu1 %v490_v23 }
 0x1e0   : > { %3435 = vmatprep.subr.bf16.mxu1 %v3734_v1 }
 0x1e1   : > { %v536_v25 = vpop.permute.xlu0 %535 }
 0x1e2   : > { %v541_v26 = vsel %vm383_vm2, %v536_v25, 0  ;;  %3420 = vmatmul.mubr.msk.bf16.vlgmr.msra.gmra.mrb[4].mxu0 %vm383_vm2, %v432_v24 }
 0x1e3   : > { %3430 = vmatpush3.bf16.xpose.msra.mxu0 %v541_v26  ;;  %3431 = vmatprep.mubr.msk.bf16.mxu0 %vm3735_vm0, %v3734_v1 }
 0x1e4   : > { %3441 = vmatprep.subr.bf16.mxu0 %v3734_v1 }
 0x1e5   : > { %v534_v28 = vpop.permute.xlu0 %533 }
 0x1e6   : > { %3426 = vmatmul.mubr.msk.bf16.vlgmr.msra.gmra.mrb[4].mxu1 %vm383_vm2, %v483_v27 }
 0x1e7   : > { %3437 = vmatprep.mubr.msk.bf16.mxu1 %vm3735_vm0, %v3734_v1 }
 0x1ea   : > { %3432 = vmatmul.mubr.msk.bf16.vlgmr.msra.gmra.mrb[8].mxu0 %vm383_vm2, %v534_v28 }
 0x1eb   : > { %3443 = vmatprep.mubr.msk.bf16.mxu0 %vm3735_vm0, %v3734_v1 }
 0x244   : > { %v424_v29 = vpop.f32.mrb[0].mxu1 }
 0x245   : > { %v3415_v30 = vpop.f32.mrb[1].mxu1  ;;  %v583_v31 = vsel %vm383_vm2, %v424_v29, -inf }
 0x246   : > { %584 = vmax.xlane.f32.xlu1 %v583_v31  ;;  %v427_v32 = vpop.f32.mrb[2].mxu1 }
 0x247   : > { %v3416_v33 = vpop.f32.mrb[3].mxu1 }
 0x2b5   : > { %v475_v34 = vpop.f32.mrb[4].mxu0 }
 0x2b6   : > { %v3421_v35 = vpop.f32.mrb[5].mxu0  ;;  %v586_v36 = vsel %vm383_vm2, %v475_v34, -inf }
 0x2b7   : > { %587 = vmax.xlane.f32.xlu0 %v586_v36  ;;  %v478_v37 = vpop.f32.mrb[6].mxu0  ;;  %v3519_v35 = vld [vmem:[%s4631_s3] sm:$0xff]   ;;  %v3520_v36 = vld [vmem:[%s4631_s3 + $0x8] sm:$0xff]  }
 0x2b8   : > { %v3422_v38 = vpop.f32.mrb[7].mxu0 }
 0x2b9   : > { %v526_v39 = vpop.f32.mrb[4].mxu1 }
 0x2ba   : > { %v3427_v40 = vpop.f32.mrb[5].mxu1  ;;  %v589_v41 = vsel %vm383_vm2, %v526_v39, -inf }
 0x2bb   : > { %v529_v42 = vpop.f32.mrb[6].mxu1  ;;  %590 = vmax.xlane.f32.xlu0 %v589_v41 }
 0x2bc   : > { %v3428_v43 = vpop.f32.mrb[7].mxu1 }
 0x2bd   : > { %v577_v44 = vpop.f32.mrb[8].mxu0 }
 0x2be   : > { %v3433_v45 = vpop.f32.mrb[9].mxu0  ;;  %v592_v46 = vsel %vm383_vm2, %v577_v44, -inf }
 0x2bf   : > { %593 = vmax.xlane.f32.xlu1 %v592_v46  ;;  %v580_v47 = vpop.f32.mrb[10].mxu0 }
 0x2c0   : > { %v3434_v48 = vpop.f32.mrb[11].mxu0 }
 0x2d0   : > { %680 = vrot.lane.b32.xlu1 %v3872_v13, %s3741_s18 }
 0x2d1   : > { %631 = vrot.lane.b32.xlu0 %v3867_v10, %s3741_s18 }
 0x2d3   : > { %v585_v49 = vpop.xlane.xlu1 %584 }
 0x2d4   : > { %v595_v50 = vsub.f32 %v424_v29, %v585_v49 }
 0x2d6   : > { %v599_v51 = vmul.f32 1.442695, %v595_v50 }
 0x2d8   : > { %3649 = vpow2.f32 %v599_v51 }
 0x2e2   : > { %v3650_v52 = vpop.eup %3649 }
 0x2e3   : > { %v607_v53 = vsel %vm383_vm2, %v3650_v52, 0.0 }
 0x2f0   : > { %608 = vadd.xlane.f32.xlu0 %v607_v53 }
 0x344   : > { %v588_v54 = vpop.xlane.xlu0 %587 }
 0x345   : > { %v596_v55 = vsub.f32 %v475_v34, %v588_v54 }
 0x347   : > { %v601_v56 = vmul.f32 1.442695, %v596_v55  ;;  %v845_v55 = vlaneseq }
 0x348   : > { %v591_v57 = vpop.xlane.xlu0 %590 }
 0x349   : > { %3651 = vpow2.f32 %v601_v56  ;;  %v597_v58 = vsub.f32 %v526_v39, %v591_v57  ;;  %v3947_v56 = vshrl.u32 %v845_v55, 7 }
 0x34b   : > { %v603_v59 = vmul.f32 1.442695, %v597_v58  ;;  %v3950_v57 = vsub.s32 0, %v3947_v56  ;;  %v3955_v58 = vld [vmem:[%s4635_s7] sm:$0x3f] }
 0x34c   : > { %v632_v60 = vpop.permute.xlu0 %631  ;;  %v594_v61 = vpop.xlane.xlu1 %593 }
 0x34d   : > { %3653 = vpow2.f32 %v603_v59  ;;  %v638_v62 = vsel %vm636_vm3, %v632_v60, 0  ;;  %v598_v63 = vsub.f32 %v577_v44, %v594_v61  ;;  %v848_v59 = vrot.slane %v3955_v58, %v3950_v57 }
 0x34e   : > { %3436 = vmatpush3.bf16.msra.mxu1 %v638_v62 }
 0x34f   : > { %v605_v0 = vmul.f32 1.442695, %v598_v63  ;;  %3447 = vmatprep.subr.bf16.mxu1 %v3734_v1 }
 0x350   : > { %v681_v2 = vpop.permute.xlu1 %680 }
 0x351   : > { %3655 = vpow2.f32 %v605_v0  ;;  %v686_v3 = vsel %vm636_vm3, %v681_v2, 0 }
 0x352   : > { %3442 = vmatpush3.bf16.msra.mxu0 %v686_v3 }
 0x353   : > { %v3652_v4 = vpop.eup %3651  ;;  %3453 = vmatprep.subr.bf16.mxu0 %v3734_v1 }
 0x354   : > { %v610_v5 = vsel %vm383_vm2, %v3652_v4, 0.0 }
 0x355   : > { %611 = vadd.xlane.f32.xlu1 %v610_v5 }
 0x357   : > { %v3654_v7 = vpop.eup %3653 }
 0x358   : > { %v613_v8 = vsel %vm383_vm2, %v3654_v7, 0.0 }
 0x359   : > { %614 = vadd.xlane.f32.xlu0 %v613_v8 }
 0x35b   : > { %v3656_v9 = vpop.eup %3655 }
 0x35c   : > { %v616_v10 = vsel %vm383_vm2, %v3656_v9, 0.0 }
 0x35d   : > { %617 = vadd.xlane.f32.xlu1 %v616_v10  ;;  %v931_v10 = vld [vmem:[%s4632_s4] sm:$0xff] }
 0x36e   : > { %728 = vrot.lane.b32.xlu1 %v3876_v16, %s3741_s18 }
 0x36f   : > { %776 = vrot.lane.b32.xlu0 %v3882_v18, %s3741_s18  ;;  %s3205_s18 = sshll.u32 %s3813_s9, 7  ;;  %s3746_s9 = smov [#allocation2]  }
 0x370   : > { %s3674_s26 = sshll.u32 %s3746_s9, 4  ;;  %s3675_s26 = int_to_ptr.vmem [resolvable:$false] %s3674_s26 }
 0x371   : > { %s3676_s10 = scalar_lea.vmem %s3675_s26, 256  ;;  %p3677_p0 = scmp.lt.s32.totalorder %s4587_s20, %s3675_s26 }
 0x37d   : > { %v609_v11 = vpop.xlane.xlu0 %608 }
 0x37e   : > { %3657 = vrcp.f32 %v609_v11  ;;  %v939_v11 = vld [vmem:[%s4632_s4 + $0x40] sm:$0xff] }
 0x388   : > { %v3658_v12 = vpop.eup %3657 }
 0x389   : > { %v620_v13 = vmul.f32 %v3658_v12, %v3650_v52  ;;  %v3037_v12 = vcombine.high %v931_v10, %v939_v11 }
 0x38b   : > { %v627_v14 = vpack.c.bf16 %v620_v13, %v620_v13  ;;  %v940_v13 = vld [vmem:[%s4632_s4 + $0x48] sm:$0xff] }
 0x38d   : > { %3438 = vmatmul.mubr.msk.bf16.vlgmr.msra.gmra.mrb[8].mxu1 %vm383_vm2, %v627_v14  ;;  %v3036_v14 = vcombine.low %v931_v10, %v939_v11  ;;  %v946_v10 = vld [vmem:[%s4632_s4 + $0x78] sm:$0xff] }
 0x38e   : > { %3449 = vmatprep.mubr.msk.bf16.mxu1 %vm3735_vm0, %v3734_v1 }
 0x3e2   : > { %v612_v15 = vpop.xlane.xlu1 %611 }
 0x3e3   : > { %3659 = vrcp.f32 %v612_v15 }
 0x3e6   : > { %v615_v17 = vpop.xlane.xlu0 %614 }
 0x3e7   : > { %3661 = vrcp.f32 %v615_v17 }
 0x3ea   : > { %v618_v19 = vpop.xlane.xlu1 %617  ;;  %v777_v18 = vpop.permute.xlu0 %776 }
 0x3eb   : > { %3663 = vrcp.f32 %v618_v19  ;;  %v782_v26 = vsel %vm636_vm3, %v777_v18, 0  ;;  %v947_v19 = vld [vmem:[%s4632_s4 + $0x80] sm:$0xff]  ;;  %v956_v18 = vld [vmem:[%s4632_s4 + $0xc8] sm:$0xff] }
 0x3ed   : > { %v3660_v16 = vpop.eup %3659 }
 0x3ee   : > { %v622_v20 = vmul.f32 %v3660_v16, %v3652_v4  ;;  %v729_v21 = vpop.permute.xlu1 %728  ;;  %v955_v16 = vld [vmem:[%s4632_s4 + $0xc0] sm:$0xff] }
 0x3ef   : > { %v734_v22 = vsel %vm636_vm3, %v729_v21, 0  ;;  %v3053_v21 = vcombine.high %v947_v19, %v955_v16 }
 0x3f0   : > { %3448 = vmatpush3.bf16.msra.mxu1 %v734_v22  ;;  %v628_v23 = vpack.c.bf16 %v622_v20, %v622_v20  ;;  %v948_v20 = vld [vmem:[%s4632_s4 + $0x88] sm:$0xff]  ;;  %v3052_v22 = vcombine.low %v947_v19, %v955_v16  ;;  %v962_v19 = vld [vmem:[%s4632_s4 + $0xf8] sm:$0xff] }
 0x3f1   : > { %v3662_v24 = vpop.eup %3661  ;;  %3459 = vmatprep.subr.bf16.mxu1 %v3734_v1 }
 0x3f2   : > { %v624_v25 = vmul.f32 %v3662_v24, %v3654_v7  ;;  %3444 = vmatmul.mubr.msk.bf16.vlgmr.msra.gmra.mrb[12].mxu0 %vm383_vm2, %v628_v23  ;;  %v3054_v23 = vcombine.low %v948_v20, %v956_v18  ;;  %v3055_v24 = vcombine.high %v948_v20, %v956_v18 }
 0x3f3   : > { %3454 = vmatpush3.bf16.msra.mxu0 %v782_v26  ;;  %3455 = vmatprep.mubr.msk.bf16.mxu0 %vm3735_vm0, %v3734_v1  ;;  %v941_v26 = vld [vmem:[%s4632_s4 + $0x50] sm:$0xff] }
 0x3f4   : > { %v629_v27 = vpack.c.bf16 %v624_v25, %v624_v25  ;;  %1210 = vmatprep.subr.bf16.mxu0 %v3037_v12  ;;  %v933_v25 = vld [vmem:[%s4632_s4 + $0x10] sm:$0xff] }
 0x3f5   : > { %v3664_v28 = vpop.eup %3663 }
 0x3f6   : > { %v626_v29 = vmul.f32 %v3664_v28, %v3656_v9  ;;  %3450 = vmatmul.mubr.msk.bf16.vlgmr.msra.gmra.mrb[12].mxu1 %vm383_vm2, %v629_v27  ;;  %v934_v27 = vld [vmem:[%s4632_s4 + $0x18] sm:$0xff]  ;;  %v3745_v28 = vmov 0  }
 0x3f7   : > { %3463 = vmatprep.mubr.msk.bf16.mxu1 %vm3735_vm0, %v3734_v1  ;;  %3460 = vmatpush3.bf16.msra.mxu1 %v3519_v35 }
 0x3f8   : > { %v630_v30 = vpack.c.bf16 %v626_v29, %v626_v29  ;;  %3461 = vmatprep.subr.bf16.mxu1 %v3734_v1  ;;  %v3041_v29 = vcombine.high %v933_v25, %v941_v26 }
 0x3fa   : > { %3456 = vmatmul.mubr.msk.bf16.vlgmr.msra.gmra.mrb[16].mxu0 %vm383_vm2, %v630_v30  ;;  %v942_v30 = vld [vmem:[%s4632_s4 + $0x58] sm:$0xff] }
 0x3fb   : > { %3462 = vmatpush3.bf16.msra.mxu1 %v3520_v36  ;;  %1211 = vmatpush1.bf16.msra.mxu0 %v3036_v14  ;;  %v953_v14 = vld [vmem:[%s4632_s4 + $0xb0] sm:$0xff] }
 0x3fc   : > { %1212 = vmatprep.subr.bf16.mxu0 %v3053_v21  ;;  %1242 = vmatprep.mubr.bf16.mxu0 %v3745_v28 }
 0x3ff   : > { %1213 = vmatpush1.bf16.msra.mxu0 %v3052_v22 }
 0x400   : > { %1292 = vmatprep.subr.bf16.mxu0 %v3041_v29  ;;  %v3525_v29 = vld [vmem:[%s4634_s6 + $0x48] sm:$0xff]  }
 0x460   : > { %v674_v31 = vpop.f32.mrb[8].mxu1 }
 0x461   : > { %v3439_v32 = vpop.f32.mrb[9].mxu1 }
 0x462   : > { %v677_v33 = vpop.f32.mrb[10].mxu1  ;;  %v3042_v32 = vcombine.low %v934_v27, %v942_v30 }
 0x463   : > { %v3440_v34 = vpop.f32.mrb[11].mxu1  ;;  %v3043_v33 = vcombine.high %v934_v27, %v942_v30  ;;  %v3524_v27 = vld [vmem:[%s4634_s6 + $0x80] sm:$0xff]   ;;  %v3527_v30 = vld [vmem:[%s4634_s6 + $0x8] sm:$0xff]  }
 0x4c5   : > { %v722_v37 = vpop.f32.mrb[12].mxu0 }
 0x4c6   : > { %825 = vrot.lane.b32.xlu1 %v722_v37, %s3742_s23  ;;  %v3445_v38 = vpop.f32.mrb[13].mxu0  ;;  %v4001_v37 = vsub.s32 1, %v3947_v56  ;;  %s4585_s23 = scalar_lea.hbm %s4636_s8, %s3205_s18 }
 0x4c7   : > { %v725_v39 = vpop.f32.mrb[14].mxu0  ;;  %v4004_v38 = vsub.s32 2, %v3947_v56 }
 0x4c8   : > { %v3446_v40 = vpop.f32.mrb[15].mxu0  ;;  %v923_v39 = vrot.slane %v3955_v58, %v4001_v37 }
 0x4c9   : > { %v770_v41 = vpop.f32.mrb[12].mxu1 }
 0x4ca   : > { %829 = vrot.lane.b32.xlu0 %v770_v41, %s3743_s24  ;;  %v3451_v42 = vpop.f32.mrb[13].mxu1  ;;  %v928_v41 = vrot.slane %v3955_v58, %v4004_v38  ;;  %s2944_s24 = scalar_lea.sflag [#allocation3], %s294_s13 }
 0x4cb   : > { %v773_v43 = vpop.f32.mrb[14].mxu1 }
 0x4cc   : > { %v3452_v44 = vpop.f32.mrb[15].mxu1 }
 0x4cd   : > { %v818_v45 = vpop.f32.mrb[16].mxu0  ;;  %v949_v44 = vld [vmem:[%s4632_s4 + $0x90] sm:$0xff] }
 0x4ce   : > { %833 = vrot.lane.b32.xlu1 %v818_v45, %s3744_s25  ;;  %v3457_v1 = vpop.f32.mrb[17].mxu0  ;;  %v957_v45 = vld [vmem:[%s4632_s4 + $0xd0] sm:$0xff]  ;;  %s3670_s25 = scalar_lea.vmem %s4587_s20, 128 }
 0x4cf   : > { %v821_v46 = vpop.f32.mrb[18].mxu0  ;;  %v950_v1 = vld [vmem:[%s4632_s4 + $0x98] sm:$0xff]  ;;  %v3056_v55 = vcombine.low %v949_v44, %v957_v45  ;;  %p3671_p11 = scmp.ne.s32.totalorder %s4587_s20, %s3670_s25  ;;  %p3678_p1 = scmp.lt.s32.totalorder %s3676_s10, %s3670_s25 }
 0x4d0   : > { %v3458_v47 = vpop.f32.mrb[19].mxu0  ;;  %v958_v46 = vld [vmem:[%s4632_s4 + $0xd8] sm:$0xff] }
 0x4d1   : > { %v3058_v58 = vcombine.low %v950_v1, %v958_v46  ;;  %p3672_p12 = pnand %p3671_p11, %p3830_p5  ;;  %p3679_p2 = por %p3678_p1, %p3677_p0 }
 0x4d3   : > { %p3673_p13 = pneg %p3672_p12 }
 0x4d5   : > { %p3680_p3 = pnand %p3679_p2, %p3673_p13 }
 0x538   : > { %v826_v48 = vpop.permute.xlu1 %825 }
 0x539   : > { %v836_v50 = vsel %vm383_vm2, %v674_v31, %v826_v48  ;;  %v3040_v31 = vcombine.low %v933_v25, %v941_v26  ;;  %v3522_v25 = vld [vmem:[%s4634_s6 + $0xc0] sm:$0xff]  }
 0x53a   : > { %v3523_v26 = vld [vmem:[%s4634_s6] sm:$0xff]  }
 0x53c   : > { %v830_v49 = vpop.permute.xlu0 %829 }
 0x53d   : > { %v837_v51 = vsel %vm320_vm1, %v836_v50, %v830_v49  ;;  %v3057_v49 = vcombine.high %v949_v44, %v957_v45  ;;  %v3059_v50 = vcombine.high %v950_v1, %v958_v46  ;;  %v3539_v44 = vld [vmem:[%s4634_s6 + $0x20] sm:$0xff]   ;;  %v3541_v1 = vld [vmem:[%s4634_s6 + $0x68] sm:$0xff]  }
 0x53e   : > { %v3540_v45 = vld [vmem:[%s4634_s6 + $0xa0] sm:$0xff]   ;;  %v3542_v46 = vld [vmem:[%s4634_s6 + $0xe8] sm:$0xff]  }
 0x540   : > { %v834_v52 = vpop.permute.xlu1 %833 }
 0x541   : > { %v839_v53 = vsel %vm838_vm4, %v837_v51, %v834_v52  ;;  %v935_v51 = vld [vmem:[%s4632_s4 + $0x20] sm:$0xff] }
 0x542   : > { %v840_v54 = vpack.c.bf16 %v839_v53, %v839_v53  ;;  %v943_v52 = vld [vmem:[%s4632_s4 + $0x60] sm:$0xff]  ;;  %v936_v53 = vld [vmem:[%s4632_s4 + $0x28] sm:$0xff] }
 0x544   : > { %3464 = vmatmul.mubr.msk.bf16.vlgmr.msra.gmra.mrb[16].mxu1 %vm861_vm5, %v840_v54  ;;  %v944_v54 = vld [vmem:[%s4632_s4 + $0x68] sm:$0xff] }
 0x545   : > { %1283 = vmatprep.mubr.bf16.mxu1 %v3745_v28 }
 0x617   : > { %v899_v60 = vpop.f32.mrb[16].mxu1 }
 0x618   : > { %v900_v61 = vadd.f32 %v899_v60, %v848_v59  ;;  %v3465_v62 = vpop.f32.mrb[17].mxu1  ;;  %v3045_v59 = vcombine.high %v935_v51, %v943_v52  ;;  %v3047_v60 = vcombine.high %v936_v53, %v944_v54 }
 0x619   : > { %v902_v63 = vpop.f32.mrb[18].mxu1  ;;  %v959_v62 = vld [vmem:[%s4632_s4 + $0xe0] sm:$0xff] }
 0x61a   : > { %v3466_v0 = vpop.f32.mrb[19].mxu1  ;;  %v905_v2 = vadd.f32 %v900_v61, %v3861_v6  ;;  %v932_v6 = vld [vmem:[%s4632_s4 + $0x8] sm:$0xff]  ;;  %v951_v61 = vld [vmem:[%s4632_s4 + $0xa0] sm:$0xff] }
 0x61b   : > { %v3038_v15 = vcombine.low %v932_v6, %v940_v13  ;;  %v3039_v17 = vcombine.high %v932_v6, %v940_v13  ;;  %v952_v63 = vld [vmem:[%s4632_s4 + $0xa8] sm:$0xff]  ;;  %v3060_v11 = vcombine.low %v951_v61, %v959_v62 }
 0x61c   : > { %v906_v3 = vsel %vm861_vm5, %v905_v2, 0.0  ;;  %v960_v0 = vld [vmem:[%s4632_s4 + $0xe8] sm:$0xff] }
 0x61d   : > { %907 = vadd.xlane.f32.xlu0 %v906_v3  ;;  %1251 = vmatprep.subr.bf16.mxu1 %v3039_v17  ;;  %v3046_v3 = vcombine.low %v936_v53, %v944_v54  ;;  %v3062_v6 = vcombine.low %v952_v63, %v960_v0  ;;  %v954_v17 = vld [vmem:[%s4632_s4 + $0xb8] sm:$0xff]  ;;  %v3548_v53 = vld [vmem:[%s4634_s6 + $0xb0] sm:$0xff]  }
 0x61e   : > { %1252 = vmatpush1.bf16.msra.mxu1 %v3038_v15  ;;  %v961_v15 = vld [vmem:[%s4632_s4 + $0xf0] sm:$0xff]  ;;  %v3067_v18 = vcombine.high %v954_v17, %v962_v19  ;;  %v3549_v54 = vld [vmem:[%s4634_s6 + $0x78] sm:$0xff]  }
 0x61f   : > { %1253 = vmatprep.subr.bf16.mxu1 %v3055_v24  ;;  %v3065_v21 = vcombine.high %v953_v14, %v961_v15  ;;  %v3064_v22 = vcombine.low %v953_v14, %v961_v15  ;;  %v3521_v24 = vld [vmem:[%s4634_s6 + $0x40] sm:$0xff]  }
 0x622   : > { %1254 = vmatpush1.bf16.msra.mxu1 %v3054_v23  ;;  %v3066_v23 = vcombine.low %v954_v17, %v962_v19 }
 0x623   : > { %1333 = vmatprep.subr.bf16.mxu1 %v3043_v33  ;;  %v3530_v33 = vld [vmem:[%s4634_s6 + $0xd0] sm:$0xff]  }
 0x6aa   : > { %v908_v4 = vpop.xlane.xlu0 %907 }
 0x6ab   : > { %v910_v5 = vmul.f32 0.03125, %v908_v4  ;;  %v3061_v4 = vcombine.high %v951_v61, %v959_v62  ;;  %v3554_v61 = vld [vmem:[%s4634_s6 + $0x1c0] sm:$0xff]   ;;  %v993_v62 = vsub.s32 6, %v3947_v56 }
 0x6ad   : > { %v911_v7 = vsub.f32 %v905_v2, %v910_v5  ;;  %v3044_v2 = vcombine.low %v935_v51, %v943_v52  ;;  %v3063_v5 = vcombine.high %v952_v63, %v960_v0  ;;  %v3546_v51 = vld [vmem:[%s4634_s6 + $0xf0] sm:$0xff]   ;;  %v4204_v63 = vld [vmem:[%s4633_s5 + $0x8] sm:$0xff] }
 0x6ae   : > { %v3547_v52 = vld [vmem:[%s4634_s6 + $0x30] sm:$0xff]   ;;  %v4209_v0 = vrot.slane %v4204_v63, %v993_v62 }
 0x6af   : > { %v912_v8 = vmul.f32 %v911_v7, %v911_v7 }
 0x6b1   : > { %v913_v9 = vsel %vm861_vm5, %v912_v8, 0.0  ;;  %v945_v8 = vld [vmem:[%s4632_s4 + $0x70] sm:$0xff] }
 0x6b2   : > { %914 = vadd.xlane.f32.xlu1 %v913_v9  ;;  %v938_v9 = vld [vmem:[%s4632_s4 + $0x38] sm:$0xff] }
 0x6b3   : > { %v3051_v13 = vcombine.high %v938_v9, %v946_v10  ;;  %v3050_v20 = vcombine.low %v938_v9, %v946_v10 }
 0x73f   : > { %v915_v34 = vpop.xlane.xlu1 %914 }
 0x740   : > { %v916_v35 = vmul.f32 0.03125, %v915_v34  ;;  %v3531_v34 = vld [vmem:[%s4634_s6 + $0x10] sm:$0xff]  }
 0x742   : > { %v917_v36 = vadd.f32 1e-05, %v916_v35  ;;  %v3532_v35 = vld [vmem:[%s4634_s6 + $0x90] sm:$0xff]  }
 0x744   : > { %3665 = vrsqrt.f32 %v917_v36  ;;  %v3533_v36 = vld [vmem:[%s4634_s6 + $0x58] sm:$0xff]  }
 0x74e   : > { %v3666_v40 = vpop.eup %3665 }
 0x74f   : > { %v919_v42 = vmul.f32 %v3666_v40, %v911_v7  ;;  %v937_v7 = vld [vmem:[%s4632_s4 + $0x30] sm:$0xff]  ;;  %v3535_v40 = vld [vmem:[%s4634_s6 + $0x18] sm:$0xff]  }
 0x750   : > { %v3049_v12 = vcombine.high %v937_v7, %v945_v8  ;;  %v3048_v16 = vcombine.low %v937_v7, %v945_v8 }
 0x751   : > { %v924_v43 = vmul.f32 %v923_v39, %v919_v42  ;;  %v3534_v39 = vld [vmem:[%s4634_s6 + $0xd8] sm:$0xff]   ;;  %v3537_v42 = vld [vmem:[%s4634_s6 + $0x60] sm:$0xff]  }
 0x753   : > { %v4022_v47 = vadd.f32 %v928_v41, %v924_v43  ;;  %v3536_v41 = vld [vmem:[%s4634_s6 + $0x98] sm:$0xff]   ;;  %v3538_v43 = vld [vmem:[%s4634_s6 + $0xe0] sm:$0xff]  }
 0x755   : > { %v4026_v48 = vpack.c.bf16 %v4022_v47, %v4022_v47 }
 0x757   : > { %3068 = vmatmul.mubr.msk.bf16.vlgmr.msra.gmra.mrb[20].mxu0 %vm861_vm5, %v4026_v48  ;;  %3069 = vmatmul.mubr.msk.bf16.vlgmr.msra.gmra.mrb[20].mxu1 %vm861_vm5, %v4026_v48 }
 0x758   : > { %1293 = vmatpush1.bf16.msra.mxu0 %v3040_v31  ;;  %1334 = vmatpush1.bf16.msra.mxu1 %v3042_v32  ;;  %v3528_v31 = vld [vmem:[%s4634_s6 + $0x88] sm:$0xff]   ;;  %v3529_v32 = vld [vmem:[%s4634_s6 + $0x50] sm:$0xff]  }
 0x759   : > { %1294 = vmatprep.subr.bf16.mxu0 %v3057_v49  ;;  %1335 = vmatprep.subr.bf16.mxu1 %v3059_v50  ;;  %v3544_v49 = vld [vmem:[%s4634_s6 + $0xa8] sm:$0xff]   ;;  %v3545_v50 = vld [vmem:[%s4634_s6 + $0x70] sm:$0xff]  }
 0x75a   : > { %1324 = vmatprep.mubr.bf16.mxu0 %v3745_v28  ;;  %1365 = vmatprep.mubr.bf16.mxu1 %v3745_v28 }
 0x75c   : > { %1295 = vmatpush1.bf16.msra.mxu0 %v3056_v55  ;;  %1336 = vmatpush1.bf16.msra.mxu1 %v3058_v58  ;;  %v3550_v55 = vld [vmem:[%s4634_s6 + $0xf8] sm:$0xff]  }
 0x75d   : > { %1374 = vmatprep.subr.bf16.mxu0 %v3045_v59  ;;  %1415 = vmatprep.subr.bf16.mxu1 %v3047_v60  ;;  %v3551_v58 = vld [vmem:[%s4634_s6 + $0x38] sm:$0xff]   ;;  %v3553_v60 = vld [vmem:[%s4634_s6 + $0x140] sm:$0xff]  }
 0x75e   : > { %v3552_v59 = vld [vmem:[%s4634_s6 + $0xb8] sm:$0xff]  }
 0x75f   : > { %3070 = vmatmul.mubr.msk.bf16.vlgmr.msra.gmra.mrb[24].mxu0 %vm861_vm5, %v4026_v48  ;;  %3071 = vmatmul.mubr.msk.bf16.vlgmr.msra.gmra.mrb[24].mxu1 %vm861_vm5, %v4026_v48 }
 0x760   : > { %1375 = vmatpush1.bf16.msra.mxu0 %v3044_v2  ;;  %1416 = vmatpush1.bf16.msra.mxu1 %v3046_v3  ;;  %v4214_v2 = vld [vmem:[%s4633_s5] sm:$0xff]  ;;  %v4217_v3 = vsub.s32 3, %v3947_v56 }
 0x761   : > { %1376 = vmatprep.subr.bf16.mxu0 %v3061_v4  ;;  %1417 = vmatprep.subr.bf16.mxu1 %v3063_v5  ;;  %v970_v4 = vrot.slane %v4214_v2, %v3950_v57  ;;  %v978_v5 = vrot.slane %v4214_v2, %v4004_v38  ;;  %v974_v7 = vrot.slane %v4214_v2, %v4001_v37 }
 0x762   : > { %1406 = vmatprep.mubr.bf16.mxu0 %v3745_v28  ;;  %1447 = vmatprep.mubr.bf16.mxu1 %v3745_v28  ;;  %v982_v8 = vrot.slane %v4214_v2, %v4217_v3 }
 0x764   : > { %1377 = vmatpush1.bf16.msra.mxu0 %v3060_v11  ;;  %1418 = vmatpush1.bf16.msra.mxu1 %v3062_v6 }
 0x765   : > { %1456 = vmatprep.subr.bf16.mxu0 %v3049_v12  ;;  %1497 = vmatprep.subr.bf16.mxu1 %v3051_v13 }
 0x767   : > { %3072 = vmatmul.mubr.msk.bf16.vlgmr.msra.gmra.mrb[28].mxu0 %vm861_vm5, %v4026_v48  ;;  %3073 = vmatmul.mubr.msk.bf16.vlgmr.msra.gmra.mrb[28].mxu1 %vm861_vm5, %v4026_v48 }
 0x768   : > { %1457 = vmatpush1.bf16.msra.mxu0 %v3048_v16  ;;  %1498 = vmatpush1.bf16.msra.mxu1 %v3050_v20  ;;  %v4228_v16 = vsub.s32 5, %v3947_v56  ;;  %v997_v20 = vsub.s32 7, %v3947_v56 }
 0x769   : > { %1458 = vmatprep.subr.bf16.mxu0 %v3065_v21  ;;  %1499 = vmatprep.subr.bf16.mxu1 %v3067_v18 }
 0x76a   : > { %1488 = vmatprep.mubr.bf16.mxu0 %v3745_v28  ;;  %1529 = vmatprep.mubr.bf16.mxu1 %v3745_v28  ;;  %v3526_v28 = vld [vmem:[%s4634_s6 + $0xc8] sm:$0xff]  }
 0x76c   : > { %1459 = vmatpush1.bf16.msra.mxu0 %v3064_v22  ;;  %1500 = vmatpush1.bf16.msra.mxu1 %v3066_v23 }
 0x76d   : > { %3229 = vmatprep.subr.bf16.mxu0 %v3521_v24  ;;  %3251 = vmatprep.subr.bf16.mxu1 %v3522_v25 }
 0x76f   : > { %3074 = vmatmul.mubr.msk.bf16.vlgmr.msra.gmra.mrb[32].mxu0 %vm861_vm5, %v4026_v48  ;;  %3075 = vmatmul.mubr.msk.bf16.vlgmr.msra.gmra.mrb[32].mxu1 %vm861_vm5, %v4026_v48  ;;  %v3543_v48 = vld [vmem:[%s4634_s6 + $0x28] sm:$0xff]  }
 0x770   : > { %3230 = vmatpush3.bf16.msra.mxu0 %v3523_v26  ;;  %3252 = vmatpush3.bf16.msra.mxu1 %v3524_v27 }
 0x771   : > { %3231 = vmatprep.subr.bf16.mxu0 %v3525_v29  ;;  %3253 = vmatprep.subr.bf16.mxu1 %v3526_v28  ;;  %v990_v29 = vrot.slane %v4214_v2, %v4228_v16  ;;  %v998_v28 = vrot.slane %v4214_v2, %v997_v20 }
 0x774   : > { %3232 = vmatpush3.bf16.msra.mxu0 %v3527_v30  ;;  %3254 = vmatpush3.bf16.msra.mxu1 %v3528_v31  ;;  %v3555_v30 = vld [vmem:[%s4634_s6 + $0x100] sm:$0xff]  }
 0x775   : > { %3233 = vmatprep.subr.bf16.mxu0 %v3529_v32  ;;  %3255 = vmatprep.subr.bf16.mxu1 %v3530_v33  ;;  %v3556_v31 = vld [vmem:[%s4634_s6 + $0x180] sm:$0xff]  }
 0x778   : > { %3234 = vmatpush3.bf16.msra.mxu0 %v3531_v34  ;;  %3256 = vmatpush3.bf16.msra.mxu1 %v3532_v35  ;;  %v3557_v34 = vld [vmem:[%s4634_s6 + $0x148] sm:$0xff]  }
 0x779   : > { %3235 = vmatprep.subr.bf16.mxu0 %v3533_v36  ;;  %3257 = vmatprep.subr.bf16.mxu1 %v3534_v39  ;;  %v3558_v35 = vld [vmem:[%s4634_s6 + $0x1c8] sm:$0xff]  }
 0x77c   : > { %3236 = vmatpush3.bf16.msra.mxu0 %v3535_v40  ;;  %3258 = vmatpush3.bf16.msra.mxu1 %v3536_v41 }
 0x77d   : > { %3237 = vmatprep.subr.bf16.mxu0 %v3537_v42  ;;  %3259 = vmatprep.subr.bf16.mxu1 %v3538_v43 }
 0x780   : > { %3238 = vmatpush3.bf16.msra.mxu0 %v3539_v44  ;;  %3260 = vmatpush3.bf16.msra.mxu1 %v3540_v45 }
 0x781   : > { %3239 = vmatprep.subr.bf16.mxu0 %v3541_v1  ;;  %3261 = vmatprep.subr.bf16.mxu1 %v3542_v46  ;;  %v3559_v1 = vld [vmem:[%s4634_s6 + $0x108] sm:$0xff]  }
 0x782   : > { %v3560_v46 = vld [vmem:[%s4634_s6 + $0x188] sm:$0xff]  }
 0x784   : > { %3240 = vmatpush3.bf16.msra.mxu0 %v3543_v48  ;;  %3262 = vmatpush3.bf16.msra.mxu1 %v3544_v49 }
 0x785   : > { %3241 = vmatprep.subr.bf16.mxu0 %v3545_v50  ;;  %3263 = vmatprep.subr.bf16.mxu1 %v3546_v51  ;;  %v3561_v50 = vld [vmem:[%s4634_s6 + $0x150] sm:$0xff]  }
 0x786   : > { %v3562_v51 = vld [vmem:[%s4634_s6 + $0x1d0] sm:$0xff]  }
 0x788   : > { %3242 = vmatpush3.bf16.msra.mxu0 %v3547_v52  ;;  %3264 = vmatpush3.bf16.msra.mxu1 %v3548_v53 }
 0x789   : > { %3243 = vmatprep.subr.bf16.mxu0 %v3549_v54  ;;  %3265 = vmatprep.subr.bf16.mxu1 %v3550_v55 }
 0x78c   : > { %3244 = vmatpush3.bf16.msra.mxu0 %v3551_v58  ;;  %3266 = vmatpush3.bf16.msra.mxu1 %v3552_v59  ;;  %v3563_v58 = vld [vmem:[%s4634_s6 + $0x110] sm:$0xff]  }
 0x78d   : > { %3273 = vmatprep.subr.bf16.mxu0 %v3553_v60  ;;  %3295 = vmatprep.subr.bf16.mxu1 %v3554_v61  ;;  %v3564_v59 = vld [vmem:[%s4634_s6 + $0x190] sm:$0xff]   ;;  %v3565_v60 = vld [vmem:[%s4634_s6 + $0x158] sm:$0xff]  }
 0x78e   : > { %v3566_v61 = vld [vmem:[%s4634_s6 + $0x1d8] sm:$0xff]  }
 0x82a   : > { %v1244_v9 = vpop.f32.mrb[20].mxu0  ;;  %v1285_v10 = vpop.f32.mrb[20].mxu1 }
 0x82b   : > { %v1245_v11 = vadd.f32 %v1244_v9, %v970_v4  ;;  %v1286_v6 = vadd.f32 %v1285_v10, %v978_v5  ;;  %v1246_v12 = vpop.f32.mrb[21].mxu0  ;;  %v1287_v13 = vpop.f32.mrb[21].mxu1 }
 0x82c   : > { %v1247_v14 = vadd.f32 %v1246_v12, %v974_v7  ;;  %v1288_v15 = vadd.f32 %v1287_v13, %v982_v8  ;;  %v1248_v17 = vpop.f32.mrb[22].mxu0  ;;  %v1289_v19 = vpop.f32.mrb[22].mxu1  ;;  %v4287_v12 = vsub.s32 4, %v3947_v56 }
 0x82d   : > { %v1538_v21 = vmax.f32 %v1245_v11, 0.0  ;;  %v1540_v18 = vmax.f32 %v1286_v6, 0.0  ;;  %v1249_v22 = vpop.f32.mrb[23].mxu0  ;;  %v1290_v23 = vpop.f32.mrb[23].mxu1  ;;  %v3567_v11 = vld [vmem:[%s4634_s6 + $0x118] sm:$0xff]   ;;  %v3570_v17 = vld [vmem:[%s4634_s6 + $0x1e0] sm:$0xff]  }
 0x82e   : > { %v1539_v24 = vmax.f32 %v1247_v14, 0.0  ;;  %v1541_v25 = vmax.f32 %v1288_v15, 0.0  ;;  %v3568_v6 = vld [vmem:[%s4634_s6 + $0x198] sm:$0xff]   ;;  %v3569_v15 = vld [vmem:[%s4634_s6 + $0x160] sm:$0xff]   ;;  %v1018_v19 = vrot.slane %v4204_v63, %v4287_v12  ;;  %v3573_v22 = vld [vmem:[%s4634_s6 + $0x168] sm:$0xff]  }
 0x82f   : > { %v1554_v32 = vpack.c.bf16 %v1538_v21, %v1538_v21  ;;  %v1556_v33 = vpack.c.bf16 %v1540_v18, %v1540_v18  ;;  %v3571_v21 = vld [vmem:[%s4634_s6 + $0x120] sm:$0xff]   ;;  %v3574_v23 = vld [vmem:[%s4634_s6 + $0x1e8] sm:$0xff]  }
 0x830   : > { %v1555_v26 = vpack.c.bf16 %v1539_v24, %v1539_v24  ;;  %v1557_v27 = vpack.c.bf16 %v1541_v25, %v1541_v25  ;;  %v3572_v18 = vld [vmem:[%s4634_s6 + $0x1a0] sm:$0xff]  }
 0x832   : > { %v4248_v36 = vpop.f32.mrb[24].mxu0  ;;  %v4250_v39 = vpop.f32.mrb[24].mxu1  ;;  %2630 = vmatprep.mubr.bf16.mxu0 %v1555_v26  ;;  %2670 = vmatprep.mubr.bf16.mxu1 %v1557_v27 }
 0x833   : > { %v1328_v40 = vpop.f32.mrb[25].mxu0  ;;  %v1369_v41 = vpop.f32.mrb[25].mxu1  ;;  %2631 = vmatmul.mubr.bf16.vlgmr.msra.gmra.mrb[36].mxu0 %v1554_v32  ;;  %2671 = vmatmul.mubr.bf16.vlgmr.msra.gmra.mrb[36].mxu1 %v1556_v33  ;;  %v3575_v32 = vld [vmem:[%s4634_s6 + $0x128] sm:$0xff]  }
 0x834   : > { %v1329_v42 = vadd.f32 %v1328_v40, %v990_v29  ;;  %v1370_v43 = vadd.f32 %v1369_v41, %v998_v28  ;;  %3274 = vmatpush3.bf16.msra.mxu0 %v3555_v30  ;;  %3296 = vmatpush3.bf16.msra.mxu1 %v3556_v31  ;;  %v1330_v44 = vpop.f32.mrb[26].mxu0  ;;  %v1371_v45 = vpop.f32.mrb[26].mxu1  ;;  %v3576_v33 = vld [vmem:[%s4634_s6 + $0x1a8] sm:$0xff]   ;;  %v3577_v41 = vld [vmem:[%s4634_s6 + $0x170] sm:$0xff]  }
 0x835   : > { %v1331_v48 = vpop.f32.mrb[27].mxu0  ;;  %v1372_v49 = vpop.f32.mrb[27].mxu1  ;;  %3275 = vmatprep.subr.bf16.mxu0 %v3557_v34  ;;  %3297 = vmatprep.subr.bf16.mxu1 %v3558_v35  ;;  %v994_v34 = vrot.slane %v4214_v2, %v993_v62  ;;  %v1014_v44 = vrot.slane %v4204_v63, %v4217_v3  ;;  %v3579_v62 = vld [vmem:[%s4634_s6 + $0x130] sm:$0xff]  }
 0x836   : > { %v1543_v52 = vmax.f32 %v1329_v42, 0.0  ;;  %v1545_v53 = vmax.f32 %v1370_v43, 0.0  ;;  %v3578_v42 = vld [vmem:[%s4634_s6 + $0x1f0] sm:$0xff]   ;;  %v1006_v43 = vrot.slane %v4204_v63, %v4001_v37  ;;  %v3581_v37 = vld [vmem:[%s4634_s6 + $0x178] sm:$0xff]  }
 0x838   : > { %v1559_v54 = vpack.c.bf16 %v1543_v52, %v1543_v52  ;;  %v1561_v55 = vpack.c.bf16 %v1545_v53, %v1545_v53  ;;  %3276 = vmatpush3.bf16.msra.mxu0 %v3559_v1  ;;  %3298 = vmatpush3.bf16.msra.mxu1 %v3560_v46  ;;  %v1368_v1 = vadd.f32 %v4250_v39, %v994_v34  ;;  %v3582_v46 = vld [vmem:[%s4634_s6 + $0x1f8] sm:$0xff]   ;;  %v3585_v52 = vld [vmem:[%s4634_s6 + $0x240] sm:$0xff]   ;;  %v3608_v34 = vld [vmem:[%s4634_s6 + $0x2a8] sm:$0xff]  }
 0x839   : > { %3277 = vmatprep.subr.bf16.mxu0 %v3561_v50  ;;  %3299 = vmatprep.subr.bf16.mxu1 %v3562_v51  ;;  %v3584_v39 = vld [vmem:[%s4634_s6 + $0x1b8] sm:$0xff]   ;;  %v3586_v53 = vld [vmem:[%s4634_s6 + $0x2c0] sm:$0xff]  }
 0x83a   : > { %v4276_v4 = vpop.f32.mrb[28].mxu0  ;;  %v4278_v5 = vpop.f32.mrb[28].mxu1  ;;  %2710 = vmatprep.mubr.bf16.mxu0 %v1559_v54  ;;  %2750 = vmatprep.mubr.bf16.mxu1 %v1561_v55  ;;  %v1544_v51 = vmax.f32 %v1368_v1, 0.0  ;;  %v3617_v1 = vld [vmem:[%s4634_s6 + $0x340] sm:$0xff]  }
 0x83b   : > { %v1410_v7 = vpop.f32.mrb[29].mxu0  ;;  %v1451_v8 = vpop.f32.mrb[29].mxu1 }
 0x83c   : > { %3278 = vmatpush3.bf16.msra.mxu0 %v3563_v58  ;;  %3300 = vmatpush3.bf16.msra.mxu1 %v3564_v59  ;;  %v1412_v9 = vpop.f32.mrb[30].mxu0  ;;  %v1453_v10 = vpop.f32.mrb[30].mxu1  ;;  %v1411_v48 = vadd.f32 %v1410_v7, %v1006_v43  ;;  %v1452_v49 = vadd.f32 %v1451_v8, %v1014_v44  ;;  %v3587_v58 = vld [vmem:[%s4634_s6 + $0x200] sm:$0xff]   ;;  %v3589_v8 = vld [vmem:[%s4634_s6 + $0x248] sm:$0xff]   ;;  %v3611_v43 = vld [vmem:[%s4634_s6 + $0x230] sm:$0xff]  }
 0x83d   : > { %v1413_v13 = vpop.f32.mrb[31].mxu0  ;;  %v1454_v14 = vpop.f32.mrb[31].mxu1  ;;  %3279 = vmatprep.subr.bf16.mxu0 %v3565_v60  ;;  %3301 = vmatprep.subr.bf16.mxu1 %v3566_v61  ;;  %v1560_v60 = vpack.c.bf16 %v1544_v51, %v1544_v51  ;;  %v3588_v61 = vld [vmem:[%s4634_s6 + $0x280] sm:$0xff]   ;;  %v3590_v9 = vld [vmem:[%s4634_s6 + $0x2c8] sm:$0xff]  }
 0x83e   : > { %v1547_v54 = vmax.f32 %v1411_v48, 0.0  ;;  %v1549_v55 = vmax.f32 %v1452_v49, 0.0  ;;  %v3593_v13 = vld [vmem:[%s4634_s6 + $0x250] sm:$0xff]   ;;  %v3619_v48 = vld [vmem:[%s4634_s6 + $0x300] sm:$0xff]  }
 0x83f   : > { %v3594_v14 = vld [vmem:[%s4634_s6 + $0x2d0] sm:$0xff]  }
 0x840   : > { %3280 = vmatpush3.bf16.msra.mxu0 %v3567_v11  ;;  %3302 = vmatpush3.bf16.msra.mxu1 %v3568_v6  ;;  %v1563_v7 = vpack.c.bf16 %v1547_v54, %v1547_v54  ;;  %v1565_v10 = vpack.c.bf16 %v1549_v55, %v1549_v55  ;;  %v3591_v11 = vld [vmem:[%s4634_s6 + $0x208] sm:$0xff]  }
 0x841   : > { %3281 = vmatprep.subr.bf16.mxu0 %v3569_v15  ;;  %3303 = vmatprep.subr.bf16.mxu1 %v3570_v17  ;;  %v3592_v6 = vld [vmem:[%s4634_s6 + $0x288] sm:$0xff]   ;;  %v3595_v15 = vld [vmem:[%s4634_s6 + $0x210] sm:$0xff]  }
 0x842   : > { %v1490_v24 = vpop.f32.mrb[32].mxu0  ;;  %v1531_v25 = vpop.f32.mrb[32].mxu1  ;;  %v3596_v17 = vld [vmem:[%s4634_s6 + $0x290] sm:$0xff]   ;;  %v3623_v54 = vld [vmem:[%s4634_s6 + $0x308] sm:$0xff]  }
 0x843   : > { %v4309_v26 = vadd.f32 %v1490_v24, %v1018_v19  ;;  %v4312_v27 = vadd.f32 %v1531_v25, %v4209_v0  ;;  %v4314_v29 = vpop.f32.mrb[33].mxu0  ;;  %v4316_v28 = vpop.f32.mrb[33].mxu1  ;;  %v986_v0 = vrot.slane %v4214_v2, %v4287_v12  ;;  %v3580_v2 = vld [vmem:[%s4634_s6 + $0x1b0] sm:$0xff]   ;;  %v3597_v19 = vld [vmem:[%s4634_s6 + $0x258] sm:$0xff]   ;;  %v3602_v24 = vld [vmem:[%s4634_s6 + $0x2e0] sm:$0xff]  }
 0x844   : > { %3282 = vmatpush3.bf16.msra.mxu0 %v3571_v21  ;;  %3304 = vmatpush3.bf16.msra.mxu1 %v3572_v18  ;;  %v1494_v30 = vpop.f32.mrb[34].mxu0  ;;  %v1535_v31 = vpop.f32.mrb[34].mxu1  ;;  %v3598_v21 = vld [vmem:[%s4634_s6 + $0x2d8] sm:$0xff]   ;;  %v3603_v25 = vld [vmem:[%s4634_s6 + $0x220] sm:$0xff]   ;;  %v3624_v55 = vld [vmem:[%s4634_s6 + $0x388] sm:$0xff]  }
 0x845   : > { %v1495_v35 = vpop.f32.mrb[35].mxu0  ;;  %v1536_v40 = vpop.f32.mrb[35].mxu1  ;;  %3283 = vmatprep.subr.bf16.mxu0 %v3573_v22  ;;  %3305 = vmatprep.subr.bf16.mxu1 %v3574_v23  ;;  %v1327_v45 = vadd.f32 %v4248_v36, %v986_v0  ;;  %v3583_v36 = vld [vmem:[%s4634_s6 + $0x138] sm:$0xff]   ;;  %v3601_v23 = vld [vmem:[%s4634_s6 + $0x260] sm:$0xff]   ;;  %v3605_v31 = vld [vmem:[%s4634_s6 + $0x268] sm:$0xff]   ;;  %v1002_v0 = vrot.slane %v4204_v63, %v3950_v57  ;;  %v1022_v57 = vrot.slane %v4204_v63, %v4228_v16 }
 0x846   : > { %v3599_v18 = vld [vmem:[%s4634_s6 + $0x218] sm:$0xff]   ;;  %v3604_v30 = vld [vmem:[%s4634_s6 + $0x2a0] sm:$0xff]   ;;  %v3609_v35 = vld [vmem:[%s4634_s6 + $0x270] sm:$0xff]   ;;  %v1010_v40 = vrot.slane %v4204_v63, %v4004_v38 }
 0x847   : > { %v1542_v50 = vmax.f32 %v1327_v45, 0.0  ;;  %v3600_v22 = vld [vmem:[%s4634_s6 + $0x298] sm:$0xff]   ;;  %v1409_v44 = vadd.f32 %v4276_v4, %v1002_v0  ;;  %v3612_v38 = vld [vmem:[%s4634_s6 + $0x2b0] sm:$0xff]   ;;  %v1552_v0 = vmax.f32 %v4312_v27, 0.0 }
 0x848   : > { %3284 = vmatpush3.bf16.msra.mxu0 %v3575_v32  ;;  %3306 = vmatpush3.bf16.msra.mxu1 %v3576_v33  ;;  %v3606_v32 = vld [vmem:[%s4634_s6 + $0x2e8] sm:$0xff]   ;;  %v1450_v56 = vadd.f32 %v4278_v5, %v1010_v40  ;;  %v3616_v5 = vld [vmem:[%s4634_s6 + $0x2b8] sm:$0xff]  }
 0x849   : > { %3285 = vmatprep.subr.bf16.mxu0 %v3577_v41  ;;  %3307 = vmatprep.subr.bf16.mxu1 %v3578_v42  ;;  %v1558_v59 = vpack.c.bf16 %v1542_v50, %v1542_v50  ;;  %v3607_v33 = vld [vmem:[%s4634_s6 + $0x228] sm:$0xff]   ;;  %v3610_v41 = vld [vmem:[%s4634_s6 + $0x2f0] sm:$0xff]   ;;  %v1030_v42 = vrot.slane %v4204_v63, %v997_v20  ;;  %v3614_v63 = vld [vmem:[%s4634_s6 + $0x2f8] sm:$0xff]   ;;  %v1493_v20 = vadd.f32 %v4314_v29, %v1022_v57  ;;  %v1546_v45 = vmax.f32 %v1409_v44, 0.0 }
 0x84a   : > { %v3618_v29 = vld [vmem:[%s4634_s6 + $0x3c0] sm:$0xff]   ;;  %v3621_v50 = vld [vmem:[%s4634_s6 + $0x348] sm:$0xff]  }
 0x84b   : > { %v1534_v4 = vadd.f32 %v4316_v28, %v1030_v42  ;;  %v1551_v28 = vmax.f32 %v1493_v20, 0.0  ;;  %v1562_v49 = vpack.c.bf16 %v1546_v45, %v1546_v45 }
 0x84c   : > { %3286 = vmatpush3.bf16.msra.mxu0 %v3579_v62  ;;  %3308 = vmatpush3.bf16.msra.mxu1 %v3580_v2  ;;  %v3613_v62 = vld [vmem:[%s4634_s6 + $0x278] sm:$0xff]  }
 0x84d   : > { %3287 = vmatprep.subr.bf16.mxu0 %v3581_v37  ;;  %3309 = vmatprep.subr.bf16.mxu1 %v3582_v46  ;;  %v3615_v2 = vld [vmem:[%s4634_s6 + $0x238] sm:$0xff]   ;;  %v1548_v37 = vmax.f32 %v1450_v56, 0.0  ;;  %v1553_v46 = vmax.f32 %v1534_v4, 0.0  ;;  %v1567_v51 = vpack.c.bf16 %v1551_v28, %v1551_v28 }
 0x850   : > { %3288 = vmatpush3.bf16.msra.mxu0 %v3583_v36  ;;  %3310 = vmatpush3.bf16.msra.mxu1 %v3584_v39  ;;  %v3620_v36 = vld [vmem:[%s4634_s6 + $0x380] sm:$0xff]   ;;  %v1564_v39 = vpack.c.bf16 %v1548_v37, %v1548_v37 }
 0x851   : > { %3317 = vmatprep.subr.bf16.mxu0 %v3585_v52  ;;  %3339 = vmatprep.subr.bf16.mxu1 %v3586_v53  ;;  %v3622_v52 = vld [vmem:[%s4634_s6 + $0x3c8] sm:$0xff]   ;;  %v1569_v53 = vpack.c.bf16 %v1553_v46, %v1553_v46 }
 0x853   : > { %2711 = vmatmul.mubr.bf16.vlgmr.msra.gmra.mrb[40].mxu0 %v1558_v59  ;;  %2751 = vmatmul.mubr.bf16.vlgmr.msra.gmra.mrb[40].mxu1 %v1560_v60  ;;  %v3626_v59 = vld [vmem:[%s4634_s6 + $0x3d0] sm:$0xff]  }
 0x854   : > { %3318 = vmatpush3.bf16.msra.mxu0 %v3587_v58  ;;  %2790 = vmatprep.mubr.bf16.mxu0 %v1563_v7  ;;  %v3625_v58 = vld [vmem:[%s4634_s6 + $0x350] sm:$0xff]   ;;  %v3629_v7 = vld [vmem:[%s4634_s6 + $0x358] sm:$0xff]  }
 0x855   : > { %3340 = vmatpush3.bf16.msra.mxu1 %v3588_v61  ;;  %2830 = vmatprep.mubr.bf16.mxu1 %v1565_v10  ;;  %v3627_v60 = vld [vmem:[%s4634_s6 + $0x310] sm:$0xff]   ;;  %v3632_v10 = vld [vmem:[%s4634_s6 + $0x398] sm:$0xff]  }
 0x856   : > { %3319 = vmatprep.subr.bf16.mxu0 %v3589_v8  ;;  %3341 = vmatprep.subr.bf16.mxu1 %v3590_v9  ;;  %v3628_v61 = vld [vmem:[%s4634_s6 + $0x390] sm:$0xff]   ;;  %v3630_v8 = vld [vmem:[%s4634_s6 + $0x3d8] sm:$0xff]  }
 0x857   : > { %v3631_v9 = vld [vmem:[%s4634_s6 + $0x318] sm:$0xff]  }
 0x858   : > { %3320 = vmatpush3.bf16.msra.mxu0 %v3591_v11  ;;  %v3633_v11 = vld [vmem:[%s4634_s6 + $0x360] sm:$0xff]  }
 0x859   : > { %3342 = vmatpush3.bf16.msra.mxu1 %v3592_v6  ;;  %3321 = vmatprep.subr.bf16.mxu0 %v3593_v13  ;;  %v3634_v6 = vld [vmem:[%s4634_s6 + $0x3e0] sm:$0xff]  }
 0x85a   : > { %3343 = vmatprep.subr.bf16.mxu1 %v3594_v14  ;;  %v3635_v13 = vld [vmem:[%s4634_s6 + $0x320] sm:$0xff]  }
 0x85b   : > { %v3636_v14 = vld [vmem:[%s4634_s6 + $0x3a0] sm:$0xff]  }
 0x85c   : > { %3322 = vmatpush3.bf16.msra.mxu0 %v3595_v15  ;;  %v3637_v15 = vld [vmem:[%s4634_s6 + $0x368] sm:$0xff]  }
 0x85d   : > { %3344 = vmatpush3.bf16.msra.mxu1 %v3596_v17  ;;  %3323 = vmatprep.subr.bf16.mxu0 %v3597_v19  ;;  %v3638_v17 = vld [vmem:[%s4634_s6 + $0x3e8] sm:$0xff]  }
 0x85e   : > { %3345 = vmatprep.subr.bf16.mxu1 %v3598_v21  ;;  %v3639_v19 = vld [vmem:[%s4634_s6 + $0x328] sm:$0xff]  }
 0x85f   : > { %v3640_v21 = vld [vmem:[%s4634_s6 + $0x3a8] sm:$0xff]  }
 0x860   : > { %3324 = vmatpush3.bf16.msra.mxu0 %v3599_v18  ;;  %v3641_v18 = vld [vmem:[%s4634_s6 + $0x370] sm:$0xff]  }
 0x861   : > { %3346 = vmatpush3.bf16.msra.mxu1 %v3600_v22  ;;  %3325 = vmatprep.subr.bf16.mxu0 %v3601_v23  ;;  %v3642_v22 = vld [vmem:[%s4634_s6 + $0x3f0] sm:$0xff]  }
 0x862   : > { %3347 = vmatprep.subr.bf16.mxu1 %v3602_v24  ;;  %v3643_v23 = vld [vmem:[%s4634_s6 + $0x330] sm:$0xff]  }
 0x863   : > { %v3644_v24 = vld [vmem:[%s4634_s6 + $0x3b0] sm:$0xff]  }
 0x864   : > { %3326 = vmatpush3.bf16.msra.mxu0 %v3603_v25  ;;  %v3645_v25 = vld [vmem:[%s4634_s6 + $0x378] sm:$0xff]  }
 0x865   : > { %3348 = vmatpush3.bf16.msra.mxu1 %v3604_v30  ;;  %3327 = vmatprep.subr.bf16.mxu0 %v3605_v31  ;;  %v3646_v30 = vld [vmem:[%s4634_s6 + $0x3f8] sm:$0xff]  }
 0x866   : > { %3349 = vmatprep.subr.bf16.mxu1 %v3606_v32  ;;  %v3647_v31 = vld [vmem:[%s4634_s6 + $0x338] sm:$0xff]   ;;  %v1550_v32 = vmax.f32 %v4309_v26, 0.0  ;;  %v4569_v26 = vld [vmem:[%s4635_s7] sm:$0x3f] }
 0x867   : > { %v1829_v57 = vrot.slane %v4569_v26, %v4217_v3 }
 0x868   : > { %3328 = vmatpush3.bf16.msra.mxu0 %v3607_v33  ;;  %v3648_v33 = vld [vmem:[%s4634_s6 + $0x3b8] sm:$0xff]  }
 0x869   : > { %3350 = vmatpush3.bf16.msra.mxu1 %v3608_v34  ;;  %3329 = vmatprep.subr.bf16.mxu0 %v3609_v35  ;;  %v1566_v34 = vpack.c.bf16 %v1550_v32, %v1550_v32  ;;  %v1568_v35 = vpack.c.bf16 %v1552_v0, %v1552_v0 }
 0x86a   : > { %3351 = vmatprep.subr.bf16.mxu1 %v3610_v41 }
 0x86c   : > { %3330 = vmatpush3.bf16.msra.mxu0 %v3611_v43 }
 0x86d   : > { %3352 = vmatpush3.bf16.msra.mxu1 %v3612_v38  ;;  %3331 = vmatprep.subr.bf16.mxu0 %v3613_v62 }
 0x86e   : > { %3353 = vmatprep.subr.bf16.mxu1 %v3614_v63 }
 0x870   : > { %3332 = vmatpush3.bf16.msra.mxu0 %v3615_v2 }
 0x871   : > { %3354 = vmatpush3.bf16.msra.mxu1 %v3616_v5  ;;  %3361 = vmatprep.subr.bf16.mxu0 %v3617_v1 }
 0x872   : > { %3383 = vmatprep.subr.bf16.mxu1 %v3618_v29 }
 0x873   : > { %2791 = vmatmul.mubr.bf16.vlgmr.msra.gmra.mrb[44].mxu0 %v1562_v49 }
 0x874   : > { %2831 = vmatmul.mubr.bf16.vlgmr.msra.gmra.mrb[44].mxu1 %v1564_v39  ;;  %3362 = vmatpush3.bf16.msra.mxu0 %v3619_v48 }
 0x875   : > { %2870 = vmatprep.mubr.bf16.mxu0 %v1567_v51  ;;  %3384 = vmatpush3.bf16.msra.mxu1 %v3620_v36 }
 0x876   : > { %2910 = vmatprep.mubr.bf16.mxu1 %v1569_v53  ;;  %3363 = vmatprep.subr.bf16.mxu0 %v3621_v50 }
 0x877   : > { %3385 = vmatprep.subr.bf16.mxu1 %v3622_v52 }
 0x878   : > { %3364 = vmatpush3.bf16.msra.mxu0 %v3623_v54 }
 0x879   : > { %3386 = vmatpush3.bf16.msra.mxu1 %v3624_v55  ;;  %3365 = vmatprep.subr.bf16.mxu0 %v3625_v58 }
 0x87a   : > { %3387 = vmatprep.subr.bf16.mxu1 %v3626_v59 }
 0x87c   : > { %3366 = vmatpush3.bf16.msra.mxu0 %v3627_v60 }
 0x87d   : > { %3388 = vmatpush3.bf16.msra.mxu1 %v3628_v61  ;;  %3367 = vmatprep.subr.bf16.mxu0 %v3629_v7 }
 0x87e   : > { %3389 = vmatprep.subr.bf16.mxu1 %v3630_v8 }
 0x880   : > { %3368 = vmatpush3.bf16.msra.mxu0 %v3631_v9 }
 0x881   : > { %3390 = vmatpush3.bf16.msra.mxu1 %v3632_v10  ;;  %3369 = vmatprep.subr.bf16.mxu0 %v3633_v11 }
 0x882   : > { %3391 = vmatprep.subr.bf16.mxu1 %v3634_v6 }
 0x884   : > { %3370 = vmatpush3.bf16.msra.mxu0 %v3635_v13 }
 0x885   : > { %3392 = vmatpush3.bf16.msra.mxu1 %v3636_v14  ;;  %3371 = vmatprep.subr.bf16.mxu0 %v3637_v15 }
 0x886   : > { %3393 = vmatprep.subr.bf16.mxu1 %v3638_v17 }
 0x888   : > { %3372 = vmatpush3.bf16.msra.mxu0 %v3639_v19 }
 0x889   : > { %3394 = vmatpush3.bf16.msra.mxu1 %v3640_v21  ;;  %3373 = vmatprep.subr.bf16.mxu0 %v3641_v18 }
 0x88a   : > { %3395 = vmatprep.subr.bf16.mxu1 %v3642_v22 }
 0x88c   : > { %3374 = vmatpush3.bf16.msra.mxu0 %v3643_v23 }
 0x88d   : > { %3396 = vmatpush3.bf16.msra.mxu1 %v3644_v24  ;;  %3375 = vmatprep.subr.bf16.mxu0 %v3645_v25 }
 0x88e   : > { %3397 = vmatprep.subr.bf16.mxu1 %v3646_v30 }
 0x890   : > { %3376 = vmatpush3.bf16.msra.mxu0 %v3647_v31 }
 0x891   : > { %3398 = vmatpush3.bf16.msra.mxu1 %v3648_v33 }
 0x893   : > { %2871 = vmatmul.mubr.bf16.vlgmr.msra.gmra.mrb[48].mxu0 %v1566_v34 }
 0x894   : > { %2911 = vmatmul.mubr.bf16.vlgmr.msra.gmra.mrb[48].mxu1 %v1568_v35 }
 0x906   : > { %v3245_v40 = vpop.f32.mrb[36].mxu0  ;;  %v3267_v41 = vpop.f32.mrb[36].mxu1 }
 0x907   : > { %v3246_v42 = vpop.f32.mrb[37].mxu0  ;;  %v3268_v43 = vpop.f32.mrb[37].mxu1 }
 0x908   : > { %v3247_v27 = vadd.f32 %v3246_v42, %v3245_v40  ;;  %v3269_v44 = vadd.f32 %v3268_v43, %v3267_v41  ;;  %v3248_v38 = vpop.f32.mrb[38].mxu0  ;;  %v3270_v62 = vpop.f32.mrb[38].mxu1  ;;  %v2940_v41 = vrot.slane %v4569_v26, %v4228_v16 }
 0x909   : > { %v3249_v56 = vpop.f32.mrb[39].mxu0  ;;  %v3271_v63 = vpop.f32.mrb[39].mxu1 }
 0x90a   : > { %v2633_v20 = vadd.f32 %v3247_v27, %v1829_v57 }
 0x90c   : > { %v2673_v4 = vadd.f32 %v3269_v44, %v2633_v20 }
 0x926   : > { %v3289_v2 = vpop.f32.mrb[40].mxu0  ;;  %v3311_v45 = vpop.f32.mrb[40].mxu1 }
 0x927   : > { %v3290_v5 = vpop.f32.mrb[41].mxu0  ;;  %v3312_v1 = vpop.f32.mrb[41].mxu1 }
 0x928   : > { %v3291_v37 = vadd.f32 %v3290_v5, %v3289_v2  ;;  %v3313_v29 = vadd.f32 %v3312_v1, %v3311_v45  ;;  %v3292_v28 = vpop.f32.mrb[42].mxu0  ;;  %v3314_v46 = vpop.f32.mrb[42].mxu1 }
 0x929   : > { %v3293_v48 = vpop.f32.mrb[43].mxu0  ;;  %v3315_v3 = vpop.f32.mrb[43].mxu1 }
 0x92a   : > { %v2713_v49 = vadd.f32 %v3291_v37, %v2673_v4 }
 0x92c   : > { %v2753_v36 = vadd.f32 %v3313_v29, %v2713_v49 }
 0x946   : > { %v3333_v39 = vpop.f32.mrb[44].mxu0 }
 0x947   : > { %v3355_v50 = vpop.f32.mrb[44].mxu1  ;;  %v3334_v51 = vpop.f32.mrb[45].mxu0 }
 0x948   : > { %v3335_v52 = vadd.f32 %v3334_v51, %v3333_v39  ;;  %v3356_v53 = vpop.f32.mrb[45].mxu1  ;;  %v3336_v54 = vpop.f32.mrb[46].mxu0 }
 0x949   : > { %v3357_v55 = vadd.f32 %v3356_v53, %v3355_v50  ;;  %v3358_v58 = vpop.f32.mrb[46].mxu1  ;;  %v3337_v59 = vpop.f32.mrb[47].mxu0 }
 0x94a   : > { %v2793_v60 = vadd.f32 %v3335_v52, %v2753_v36  ;;  %v3359_v61 = vpop.f32.mrb[47].mxu1 }
 0x94c   : > { %v2833_v7 = vadd.f32 %v3357_v55, %v2793_v60 }
 0x966   : > { %v3377_v8 = vpop.f32.mrb[48].mxu0 }
 0x967   : > { %v3399_v9 = vpop.f32.mrb[48].mxu1  ;;  %v3378_v10 = vpop.f32.mrb[49].mxu0 }
 0x968   : > { %v3379_v11 = vadd.f32 %v3378_v10, %v3377_v8  ;;  %v3400_v6 = vpop.f32.mrb[49].mxu1  ;;  %v3380_v13 = vpop.f32.mrb[50].mxu0 }
 0x969   : > { %v3401_v14 = vadd.f32 %v3400_v6, %v3399_v9  ;;  %v3402_v15 = vpop.f32.mrb[50].mxu1  ;;  %v3381_v17 = vpop.f32.mrb[51].mxu0 }
 0x96a   : > { %v2873_v19 = vadd.f32 %v3379_v11, %v2833_v7  ;;  %v3403_v21 = vpop.f32.mrb[51].mxu1 }
 0x96c   : > { %v2913_v18 = vadd.f32 %v3401_v14, %v2873_v19 }
 0x96e   : > { %v2918_v22 = vadd.f32 %v2913_v18, %v4022_v47  ;;  %v2935_v47 = vrot.slane %v4569_v26, %v4287_v12 }
 0x970   : > { %v2919_v23 = vsel %vm861_vm5, %v2918_v22, 0.0 }
 0x971   : > { %2920 = vadd.xlane.f32.xlu0 %v2919_v23 }
 0x9fe   : > { %v2921_v24 = vpop.xlane.xlu0 %2920 }
 0x9ff   : > { %v2922_v25 = vmul.f32 0.03125, %v2921_v24 }
 0xa01   : > { %v2923_v30 = vsub.f32 %v2918_v22, %v2922_v25 }
 0xa03   : > { %v2924_v31 = vmul.f32 %v2923_v30, %v2923_v30 }
 0xa05   : > { %v2925_v32 = vsel %vm861_vm5, %v2924_v31, 0.0 }
 0xa06   : > { %2926 = vadd.xlane.f32.xlu0 %v2925_v32 }
 0xa93   : > { %v2927_v33 = vpop.xlane.xlu0 %2926 }
 0xa94   : > { %v2928_v0 = vmul.f32 0.03125, %v2927_v33 }
 0xa96   : > { %v2929_v34 = vadd.f32 1e-05, %v2928_v0 }
 0xa98   : > { %3667 = vrsqrt.f32 %v2929_v34 }
 0xaa2   : > { %v3668_v35 = vpop.eup %3667 }
 0xaa3   : > { %v2931_v40 = vmul.f32 %v3668_v35, %v2923_v30 }
 0xaa5   : > { %v2936_v57 = vmul.f32 %v2935_v47, %v2931_v40 }
 0xaa7   : > { %v2941_v42 = vadd.f32 %v2940_v41, %v2936_v57 }
 0xaa9   : > { %2942 = vst.msk [vmem:[%s296_s19] sm:$0xff] %vm861_vm5, %v2941_v42 }
 0xaaa   : > { %3683 = shalt.err (!%p3680_p3)
}
 0xaab   : > { %s3684_s12 = scalar_lea.hbm %s4585_s23, 128  ;;  %s3688_s18 = scalar_lea.hbm %s4636_s8, 256 }
 0xaac   : > { %p3685_p4 = scmp.ne.s32.totalorder %s4585_s23, %s3684_s12  ;;  %p3689_p9 = scmp.lt.u32.totalorder %s4585_s23, %s4636_s8 }
 0xaad   : > { %p3690_p10 = scmp.lt.u32.totalorder %s3688_s18, %s3684_s12  ;;  %p3692_p12 = scmp.lt.u32.totalorder %s3684_s12, %s4585_s23 }
 0xaae   : > { %p3686_p7 = pnand %p3685_p4, %p3830_p5 }
 0xaaf   : > { %p3691_p11 = por %p3690_p10, %p3689_p9 }
 0xab0   : > { %p3687_p8 = pneg %p3686_p7 }
 0xab1   : > { %p3693_p13 = por %p3692_p12, %p3691_p11 }
 0xab3   : > { %p3694_p0 = pnand %p3693_p13, %p3687_p8 }
 0xab5   : > { %3697 = shalt.err (!%p3694_p0)
}
 0xab6   : > { %3467 = dma.vmem_to_hbm [thread:$0]  (%p3830_p5), %s4587_s20, 128, %s4585_s23, %s2944_s24  }
 0xab7 PF: > { %p3473_p1 = scmp.ge.s32.totalorder %s3732_s30, 2  ;;  %s2969_s22 = sand.u32 1, %s3720_s27  }
 0xab8   : > { %s2970_s25 = scalar_lea.sflag [#allocation3], %s2969_s22 }
 0xab9   : > { %p3470_p2 = pnand %p3473_p1, %p3834_p6 }
 0xabb   : > { %3715 = dma.done.wait (!%p3470_p2), %s2970_s25, 128  }
 0xabc   : > { %3717 = vsyncadd (!%p3470_p2), %s2970_s25, 4294967168  ;;  %p18_p3 = scmp.ge.s32.totalorder %s3817_s11, 4   ;;  %s4639_s27 = smov %s3724_s28 }
 0xabd   : > { %s4640_s28 = smov %s3728_s29  ;;  %s4641_s29 = smov %s3828_s14 }
 0xabe   : > { %s4642_s30 = smov %s3817_s11  ;;  %20 = sbr.rel (!%p18_p3) target bundleno = 3 (0x3), region = 87 }
 0xac5   :  { %2975 = vsyncpa [#allocation3], 1 }
 0xac6   :  { %2977 = vsyncpa [#allocation3 + $0x1], 1 }

</bundles_post_ra>
